<compile_context>
chip_gen: v7x
topology: tpu7x:2x2x1
jax: 0.10.0
libtpu: 0.0.40
codegen_flags: <defaults>
</compile_context>

<pallas_src>
import jax
import jax.numpy as jnp
from jax.experimental import pallas as pl
from jax.experimental.pallas import tpu as pltpu


def temporal_attention_kernel(
    x_ref,    # (S, TILE_B, A)   f32 input tile (streamed per grid step)
    wfc_ref,  # (A, 256)         bf16
    w1_ref,   # (S*256, 256)     bf16  Linear(S*256 -> 256) weight
    b1_ref,   # (1, 256)         f32   (fc bias folded in)
    w2_ref,   # (256, 256)       bf16
    b2_ref,   # (1, 256)         f32
    w3_ref,   # (256, S_PAD)     bf16  zero-padded lanes
    b3_ref,   # (1, S_PAD)       f32   zero-padded lanes
    out_ref,  # (TILE_B, S_PAD)  f32
    h_ref,    # (TILE_B, S*256)  bf16  VMEM scratch: flattened fc output
):
    S, TB, A = x_ref.shape
    H = wfc_ref.shape[-1]                          # 256
    S_PAD = out_ref.shape[-1]                      # 128

    # ---- fc (bias folded into b1): per-s (TB, A) @ (A, 256) dots, results
    # stored straight into lane-aligned columns of the flat scratch.  This IS
    # the h.view(B, S*256) relayout: S plain bf16 stores, no lane re-layout.
    # Static unroll: S is small (see the S_PAD TODO for long sequences).
    for s in range(S):
        h_s = jnp.dot(x_ref[s].astype(jnp.bfloat16), wfc_ref[...],
                      preferred_element_type=jnp.float32)
        h_ref[:, s * H:(s + 1) * H] = h_s.astype(jnp.bfloat16)

    # ---- Linear(S*256 -> 256): ONE long-K MXU contraction + tanh ------------
    z = jnp.tanh(
        jnp.dot(h_ref[...], w1_ref[...], preferred_element_type=jnp.float32)
        + b1_ref[...])

    # ---- Linear(256 -> 256) + tanh -------------------------------------------
    z = jnp.tanh(
        jnp.dot(z.astype(jnp.bfloat16), w2_ref[...],
                preferred_element_type=jnp.float32) + b2_ref[...])

    # ---- Linear(256 -> S) + tanh (lane-padded to S_PAD) ----------------------
    z = jnp.tanh(
        jnp.dot(z.astype(jnp.bfloat16), w3_ref[...],
                preferred_element_type=jnp.float32) + b3_ref[...])

    # ---- softmax over the true S lanes ---------------------------------------
    # tanh output is in [-1, 1] -> exp cannot overflow, so skip the max
    # subtraction (saves one XLU cross-lane reduce + a broadcast-subtract).
    # Padded lanes are zeroed AFTER exp; divide is exact (rows sum to 1).
    e = jnp.exp(z)
    lane = jax.lax.broadcasted_iota(jnp.int32, (TB, S_PAD), 1)
    e = jnp.where(lane < S, e, 0.0)
    out_ref[...] = (e / jnp.sum(e, axis=-1, keepdims=True)).astype(out_ref.dtype)


def _round_up(n, m):
    return ((n + m - 1) // m) * m


def _choose_tile_b(batch, tile_b_max=512):
    """Batch-tile size.

    Large tiles amortize MXU weight pushes / fill-drain and per-grid-step
    overhead; an even, balanced tile count keeps v7x's two TensorCores busy
    under dimension_semantics=("parallel",) (no effect on v5e/v6e).  16-row
    alignment keeps the bf16 scratch sublane-packed (also satisfies f32's 8).
    """
    if batch <= 256:                               # single tile: splitting would
        return _round_up(max(batch, 16), 16)       # drop below an MXU-worth of rows
    if batch <= 2 * tile_b_max:                    # two balanced tiles (v7x)
        return _round_up(pl.cdiv(batch, 2), 16)
    n_tiles = pl.cdiv(batch, tile_b_max)
    n_tiles += n_tiles % 2                         # even tile count for v7x
    return _round_up(pl.cdiv(batch, n_tiles), 16)


def temporal_attention(x, params, *, tile_b=None):
    """x: (B, S, A) float32 -> softmax attention scores (B, S) float32."""
    B, S, A = x.shape
    wfc, bfc, w1, b1, w2, b2, w3, b3 = params
    H = wfc.shape[-1]                              # 256

    # Lane-dense output width (padded lanes masked inside the kernel).
    S_PAD = 128
    # TODO(synk): for seq_len > 128, pad S to a multiple of 128 and stream w1
    # as (S_blk, 256, 256) blocks over an "arbitrary" reduction grid axis; the
    # w1-resident limit is the scoped-VMEM budget (32 MiB default on v6e/v7x,
    # 16 MiB on v5e -> S ~ 64-128), not the 64 MiB physical figure.
    assert S <= S_PAD, "seq_len > 128 needs lane padding + w1 streaming"

    # ---- weight-side prep (trace/XLA time, outside the kernel) ---------------
    # NOTE(weight porting): real nn.Linear stores (out, in) weights applied as
    # x @ W.T; when loading PyTorch weights pass W.T here, and w1's (S*256, 256)
    # layout must stay s-major / hidden-minor to match h.view(B, S*256).
    b1_eff = b1 + jnp.tile(bfc, (1, S)) @ w1       # fold fc bias through w1 (exact)
    w3p = jnp.zeros((H, S_PAD), w3.dtype).at[:, :S].set(w3)
    b3p = jnp.zeros((1, S_PAD), b3.dtype).at[:, :S].set(b3)

    wfc_b = wfc.astype(jnp.bfloat16)               # bf16 MXU operands, f32 acc
    w1_b = w1.astype(jnp.bfloat16)                 # (S*256, 256)
    w2_b = w2.astype(jnp.bfloat16)
    w3_b = w3p.astype(jnp.bfloat16)

    # ---- batch tiling ----------------------------------------------------------
    tb = tile_b if tile_b is not None else _choose_tile_b(B)
    n_tiles = pl.cdiv(B, tb)
    b_pad = n_tiles * tb
    if b_pad != B:
        x = jnp.pad(x, ((0, b_pad - B), (0, 0), (0, 0)))
    xt = jnp.transpose(x, (1, 0, 2))               # (S, b_pad, A): per-s slabs contiguous

    def const(nd):
        return lambda i: (0,) * nd                 # weights: resident across grid steps

    def weight_spec(shape):
        # Constant blocks -> single-buffered: they are DMA'd once and reused
        # every grid step, so the default double-buffering only wastes VMEM.
        return pl.BlockSpec(shape, const(len(shape)),
                            pipeline_mode=pl.Buffered(1))

    # Explicit scoped-VMEM budget: resident weights + double-buffered x/out
    # tiles + the flat-h scratch, with 2x headroom; capped at v7x's 64 MiB.
    weight_bytes = (A * H + S * H * H + H * H + H * S_PAD) * 2 \
        + (2 * H + S_PAD) * 4
    tile_bytes = 2 * (S * tb * A * 4) + 2 * (tb * S_PAD * 4) + tb * S * H * 2
    vmem_limit = int(min(64 * 1024 * 1024,
                         max(32 * 1024 * 1024, 2 * (weight_bytes + tile_bytes))))

    out = pl.pallas_call(
        temporal_attention_kernel,
        out_shape=jax.ShapeDtypeStruct((b_pad, S_PAD), jnp.float32),
        grid=(n_tiles,),
        in_specs=[
            pl.BlockSpec((S, tb, A), lambda i: (0, i, 0)),   # x tile (streamed)
            weight_spec((A, H)),
            weight_spec((S * H, H)),
            weight_spec((1, H)),
            weight_spec((H, H)),
            weight_spec((1, H)),
            weight_spec((H, S_PAD)),
            weight_spec((1, S_PAD)),
        ],
        out_specs=pl.BlockSpec((tb, S_PAD), lambda i: (i, 0)),
        scratch_shapes=[pltpu.VMEM((tb, S * H), jnp.bfloat16)],
        compiler_params=pltpu.CompilerParams(
            dimension_semantics=("parallel",),     # v7x: batch tiles across 2 TCs
            vmem_limit_bytes=vmem_limit,
        ),
    )(xt, wfc_b, w1_b, b1_eff, w2_b, b2, w3_b, b3p)

    return out[:B, :S]


def init_params(key, attention_size, seq_len):
    """Deterministic synthetic parameters (shapes match the PyTorch module)."""
    ks = jax.random.split(key, 8)

    def lin(kw, kb, fan_in, fan_out):
        bound = 1.0 / jnp.sqrt(jnp.float32(fan_in))
        w = jax.random.uniform(kw, (fan_in, fan_out), jnp.float32, -bound, bound)
        b = jax.random.uniform(kb, (1, fan_out), jnp.float32, -bound, bound)
        return w, b

    wfc, bfc = lin(ks[0], ks[1], attention_size, 256)
    w1, b1 = lin(ks[2], ks[3], 256 * seq_len, 256)
    w2, b2 = lin(ks[4], ks[5], 256, 256)
    w3, b3 = lin(ks[6], ks[7], 256, seq_len)
    return (wfc, bfc, w1, b1, w2, b2, w3, b3)


def temporal_attention_ref(x, params):
    """Pure-JAX (f32) reference for correctness checking."""
    wfc, bfc, w1, b1, w2, b2, w3, b3 = params
    B = x.shape[0]
    h = jnp.einsum("bsa,ad->bsd", x, wfc) + bfc
    h = h.reshape(B, -1)
    z = jnp.tanh(h @ w1 + b1)
    z = jnp.tanh(z @ w2 + b2)
    z = jnp.tanh(z @ w3 + b3)
    return jax.nn.softmax(z, axis=-1)


if __name__ == "__main__":
    batch = 2
    seq_len = 8
    attention_size = 32

    key = jax.random.PRNGKey(0)
    kx, kp = jax.random.split(key)
    x = jax.random.normal(kx, (batch, seq_len, attention_size), jnp.float32)
    params = init_params(kp, attention_size, seq_len)

    scores = jax.block_until_ready(temporal_attention(x, params))
    ref = temporal_attention_ref(x, params)
    assert scores.shape == (batch, seq_len)
    # bf16 MXU operands -> loose tolerance vs the f32 reference.
    assert jnp.allclose(scores, ref, atol=2e-2, rtol=0), "mismatch vs reference"
    # Exact divide in the kernel -> rows sum to 1 to f32 precision.
    assert jnp.allclose(jnp.sum(scores, axis=-1), 1.0, atol=1e-3)

    # Exercise the multi-tile gridded path (260 -> 2 balanced tiles of 144,
    # batch zero-padded to 288; padded rows are sliced off).
    big_b = 260
    xb = jax.random.normal(jax.random.PRNGKey(1),
                           (big_b, seq_len, attention_size), jnp.float32)
    scores_b = jax.block_until_ready(temporal_attention(xb, params))
    ref_b = temporal_attention_ref(xb, params)
    assert scores_b.shape == (big_b, seq_len)
    assert jnp.allclose(scores_b, ref_b, atol=2e-2, rtol=0), "mismatch (gridded path)"
    assert jnp.allclose(jnp.sum(scores_b, axis=-1), 1.0, atol=1e-3)

    print("KERNEL_OK")
</pallas_src>

<mosaic_0001>
module attributes {stable_mosaic.version = 11 : i64} {
  func.func @temporal_attention_kernel(%arg0: i32, %arg1: memref<8x16x32xf32, #tpu.memory_space<vmem>>, %arg2: memref<32x256xbf16, #tpu.memory_space<vmem>>, %arg3: memref<2048x256xbf16, #tpu.memory_space<vmem>>, %arg4: memref<1x256xf32, #tpu.memory_space<vmem>>, %arg5: memref<256x256xbf16, #tpu.memory_space<vmem>>, %arg6: memref<1x256xf32, #tpu.memory_space<vmem>>, %arg7: memref<256x128xbf16, #tpu.memory_space<vmem>>, %arg8: memref<1x128xf32, #tpu.memory_space<vmem>>, %arg9: memref<16x128xf32, #tpu.memory_space<vmem>>, %arg10: memref<16x2048xbf16, #tpu.memory_space<vmem>>) attributes {dimension_semantics = [#tpu.dimension_semantics<parallel>], iteration_bounds = array<i64: 1>, scalar_prefetch = 0 : i64, scratch_operands = 1 : i64, tpu.core_type = #tpu.core_type<tc>, window_params = [{transform_indices = @transform_0, window_bounds = array<i64: 8, 16, 32>}, {pipeline_mode = #tpu.pipeline_mode<synchronous>, transform_indices = @transform_1, window_bounds = array<i64: 32, 256>}, {pipeline_mode = #tpu.pipeline_mode<synchronous>, transform_indices = @transform_2, window_bounds = array<i64: 2048, 256>}, {pipeline_mode = #tpu.pipeline_mode<synchronous>, transform_indices = @transform_3, window_bounds = array<i64: 1, 256>}, {pipeline_mode = #tpu.pipeline_mode<synchronous>, transform_indices = @transform_4, window_bounds = array<i64: 256, 256>}, {pipeline_mode = #tpu.pipeline_mode<synchronous>, transform_indices = @transform_5, window_bounds = array<i64: 1, 256>}, {pipeline_mode = #tpu.pipeline_mode<synchronous>, transform_indices = @transform_6, window_bounds = array<i64: 256, 128>}, {pipeline_mode = #tpu.pipeline_mode<synchronous>, transform_indices = @transform_7, window_bounds = array<i64: 1, 128>}, {transform_indices = @transform_8, window_bounds = array<i64: 16, 128>}]} {
    %c0 = arith.constant 0 : index
    %c0_0 = arith.constant 0 : index
    %c0_1 = arith.constant 0 : index
    %0 = vector.load %arg1[%c0, %c0_0, %c0_1] : memref<8x16x32xf32, #tpu.memory_space<vmem>>, vector<1x16x32xf32>
    %1 = vector.shape_cast %0 : vector<1x16x32xf32> to vector<16x32xf32>
    %2 = arith.truncf %1 : vector<16x32xf32> to vector<16x32xbf16>
    %c0_2 = arith.constant 0 : index
    %c0_3 = arith.constant 0 : index
    %3 = vector.load %arg2[%c0_2, %c0_3] : memref<32x256xbf16, #tpu.memory_space<vmem>>, vector<32x256xbf16>
    %cst = arith.constant dense<0.000000e+00> : vector<16x256xf32>
    %4 = tpu.matmul %2, %3, %cst {dimension_numbers = #tpu.dot_dimension_numbers<[1], [0], [0], [1], [0, 0, 1, 1], [], []>} : vector<16x32xbf16>, vector<32x256xbf16>, vector<16x256xf32> -> vector<16x256xf32>
    %5 = arith.truncf %4 : vector<16x256xf32> to vector<16x256xbf16>
    %c0_4 = arith.constant 0 : index
    %c0_5 = arith.constant 0 : index
    %6 = vector.load %arg10[%c0_4, %c0_5] : memref<16x2048xbf16, #tpu.memory_space<vmem>>, vector<16x256xbf16>
    tpu.vector_store %arg10[%c0_4, %c0_5], %5 {strides = array<i32>} : memref<16x2048xbf16, #tpu.memory_space<vmem>>, vector<16x256xbf16>,
    %c1 = arith.constant 1 : index
    %c0_6 = arith.constant 0 : index
    %c0_7 = arith.constant 0 : index
    %7 = vector.load %arg1[%c1, %c0_6, %c0_7] : memref<8x16x32xf32, #tpu.memory_space<vmem>>, vector<1x16x32xf32>
    %8 = vector.shape_cast %7 : vector<1x16x32xf32> to vector<16x32xf32>
    %9 = arith.truncf %8 : vector<16x32xf32> to vector<16x32xbf16>
    %c0_8 = arith.constant 0 : index
    %c0_9 = arith.constant 0 : index
    %10 = vector.load %arg2[%c0_8, %c0_9] : memref<32x256xbf16, #tpu.memory_space<vmem>>, vector<32x256xbf16>
    %cst_10 = arith.constant dense<0.000000e+00> : vector<16x256xf32>
    %11 = tpu.matmul %9, %10, %cst_10 {dimension_numbers = #tpu.dot_dimension_numbers<[1], [0], [0], [1], [0, 0, 1, 1], [], []>} : vector<16x32xbf16>, vector<32x256xbf16>, vector<16x256xf32> -> vector<16x256xf32>
    %12 = arith.truncf %11 : vector<16x256xf32> to vector<16x256xbf16>
    %c0_11 = arith.constant 0 : index
    %c256 = arith.constant 256 : index
    %13 = vector.load %arg10[%c0_11, %c256] : memref<16x2048xbf16, #tpu.memory_space<vmem>>, vector<16x256xbf16>
    tpu.vector_store %arg10[%c0_11, %c256], %12 {strides = array<i32>} : memref<16x2048xbf16, #tpu.memory_space<vmem>>, vector<16x256xbf16>,
    %c2 = arith.constant 2 : index
    %c0_12 = arith.constant 0 : index
    %c0_13 = arith.constant 0 : index
    %14 = vector.load %arg1[%c2, %c0_12, %c0_13] : memref<8x16x32xf32, #tpu.memory_space<vmem>>, vector<1x16x32xf32>
    %15 = vector.shape_cast %14 : vector<1x16x32xf32> to vector<16x32xf32>
    %16 = arith.truncf %15 : vector<16x32xf32> to vector<16x32xbf16>
    %c0_14 = arith.constant 0 : index
    %c0_15 = arith.constant 0 : index
    %17 = vector.load %arg2[%c0_14, %c0_15] : memref<32x256xbf16, #tpu.memory_space<vmem>>, vector<32x256xbf16>
    %cst_16 = arith.constant dense<0.000000e+00> : vector<16x256xf32>
    %18 = tpu.matmul %16, %17, %cst_16 {dimension_numbers = #tpu.dot_dimension_numbers<[1], [0], [0], [1], [0, 0, 1, 1], [], []>} : vector<16x32xbf16>, vector<32x256xbf16>, vector<16x256xf32> -> vector<16x256xf32>
    %19 = arith.truncf %18 : vector<16x256xf32> to vector<16x256xbf16>
    %c0_17 = arith.constant 0 : index
    %c512 = arith.constant 512 : index
    %20 = vector.load %arg10[%c0_17, %c512] : memref<16x2048xbf16, #tpu.memory_space<vmem>>, vector<16x256xbf16>
    tpu.vector_store %arg10[%c0_17, %c512], %19 {strides = array<i32>} : memref<16x2048xbf16, #tpu.memory_space<vmem>>, vector<16x256xbf16>,
    %c3 = arith.constant 3 : index
    %c0_18 = arith.constant 0 : index
    %c0_19 = arith.constant 0 : index
    %21 = vector.load %arg1[%c3, %c0_18, %c0_19] : memref<8x16x32xf32, #tpu.memory_space<vmem>>, vector<1x16x32xf32>
    %22 = vector.shape_cast %21 : vector<1x16x32xf32> to vector<16x32xf32>
    %23 = arith.truncf %22 : vector<16x32xf32> to vector<16x32xbf16>
    %c0_20 = arith.constant 0 : index
    %c0_21 = arith.constant 0 : index
    %24 = vector.load %arg2[%c0_20, %c0_21] : memref<32x256xbf16, #tpu.memory_space<vmem>>, vector<32x256xbf16>
    %cst_22 = arith.constant dense<0.000000e+00> : vector<16x256xf32>
    %25 = tpu.matmul %23, %24, %cst_22 {dimension_numbers = #tpu.dot_dimension_numbers<[1], [0], [0], [1], [0, 0, 1, 1], [], []>} : vector<16x32xbf16>, vector<32x256xbf16>, vector<16x256xf32> -> vector<16x256xf32>
    %26 = arith.truncf %25 : vector<16x256xf32> to vector<16x256xbf16>
    %c0_23 = arith.constant 0 : index
    %c768 = arith.constant 768 : index
    %27 = vector.load %arg10[%c0_23, %c768] : memref<16x2048xbf16, #tpu.memory_space<vmem>>, vector<16x256xbf16>
    tpu.vector_store %arg10[%c0_23, %c768], %26 {strides = array<i32>} : memref<16x2048xbf16, #tpu.memory_space<vmem>>, vector<16x256xbf16>,
    %c4 = arith.constant 4 : index
    %c0_24 = arith.constant 0 : index
    %c0_25 = arith.constant 0 : index
    %28 = vector.load %arg1[%c4, %c0_24, %c0_25] : memref<8x16x32xf32, #tpu.memory_space<vmem>>, vector<1x16x32xf32>
    %29 = vector.shape_cast %28 : vector<1x16x32xf32> to vector<16x32xf32>
    %30 = arith.truncf %29 : vector<16x32xf32> to vector<16x32xbf16>
    %c0_26 = arith.constant 0 : index
    %c0_27 = arith.constant 0 : index
    %31 = vector.load %arg2[%c0_26, %c0_27] : memref<32x256xbf16, #tpu.memory_space<vmem>>, vector<32x256xbf16>
    %cst_28 = arith.constant dense<0.000000e+00> : vector<16x256xf32>
    %32 = tpu.matmul %30, %31, %cst_28 {dimension_numbers = #tpu.dot_dimension_numbers<[1], [0], [0], [1], [0, 0, 1, 1], [], []>} : vector<16x32xbf16>, vector<32x256xbf16>, vector<16x256xf32> -> vector<16x256xf32>
    %33 = arith.truncf %32 : vector<16x256xf32> to vector<16x256xbf16>
    %c0_29 = arith.constant 0 : index
    %c1024 = arith.constant 1024 : index
    %34 = vector.load %arg10[%c0_29, %c1024] : memref<16x2048xbf16, #tpu.memory_space<vmem>>, vector<16x256xbf16>
    tpu.vector_store %arg10[%c0_29, %c1024], %33 {strides = array<i32>} : memref<16x2048xbf16, #tpu.memory_space<vmem>>, vector<16x256xbf16>,
    %c5 = arith.constant 5 : index
    %c0_30 = arith.constant 0 : index
    %c0_31 = arith.constant 0 : index
    %35 = vector.load %arg1[%c5, %c0_30, %c0_31] : memref<8x16x32xf32, #tpu.memory_space<vmem>>, vector<1x16x32xf32>
    %36 = vector.shape_cast %35 : vector<1x16x32xf32> to vector<16x32xf32>
    %37 = arith.truncf %36 : vector<16x32xf32> to vector<16x32xbf16>
    %c0_32 = arith.constant 0 : index
    %c0_33 = arith.constant 0 : index
    %38 = vector.load %arg2[%c0_32, %c0_33] : memref<32x256xbf16, #tpu.memory_space<vmem>>, vector<32x256xbf16>
    %cst_34 = arith.constant dense<0.000000e+00> : vector<16x256xf32>
    %39 = tpu.matmul %37, %38, %cst_34 {dimension_numbers = #tpu.dot_dimension_numbers<[1], [0], [0], [1], [0, 0, 1, 1], [], []>} : vector<16x32xbf16>, vector<32x256xbf16>, vector<16x256xf32> -> vector<16x256xf32>
    %40 = arith.truncf %39 : vector<16x256xf32> to vector<16x256xbf16>
    %c0_35 = arith.constant 0 : index
    %c1280 = arith.constant 1280 : index
    %41 = vector.load %arg10[%c0_35, %c1280] : memref<16x2048xbf16, #tpu.memory_space<vmem>>, vector<16x256xbf16>
    tpu.vector_store %arg10[%c0_35, %c1280], %40 {strides = array<i32>} : memref<16x2048xbf16, #tpu.memory_space<vmem>>, vector<16x256xbf16>,
    %c6 = arith.constant 6 : index
    %c0_36 = arith.constant 0 : index
    %c0_37 = arith.constant 0 : index
    %42 = vector.load %arg1[%c6, %c0_36, %c0_37] : memref<8x16x32xf32, #tpu.memory_space<vmem>>, vector<1x16x32xf32>
    %43 = vector.shape_cast %42 : vector<1x16x32xf32> to vector<16x32xf32>
    %44 = arith.truncf %43 : vector<16x32xf32> to vector<16x32xbf16>
    %c0_38 = arith.constant 0 : index
    %c0_39 = arith.constant 0 : index
    %45 = vector.load %arg2[%c0_38, %c0_39] : memref<32x256xbf16, #tpu.memory_space<vmem>>, vector<32x256xbf16>
    %cst_40 = arith.constant dense<0.000000e+00> : vector<16x256xf32>
    %46 = tpu.matmul %44, %45, %cst_40 {dimension_numbers = #tpu.dot_dimension_numbers<[1], [0], [0], [1], [0, 0, 1, 1], [], []>} : vector<16x32xbf16>, vector<32x256xbf16>, vector<16x256xf32> -> vector<16x256xf32>
    %47 = arith.truncf %46 : vector<16x256xf32> to vector<16x256xbf16>
    %c0_41 = arith.constant 0 : index
    %c1536 = arith.constant 1536 : index
    %48 = vector.load %arg10[%c0_41, %c1536] : memref<16x2048xbf16, #tpu.memory_space<vmem>>, vector<16x256xbf16>
    tpu.vector_store %arg10[%c0_41, %c1536], %47 {strides = array<i32>} : memref<16x2048xbf16, #tpu.memory_space<vmem>>, vector<16x256xbf16>,
    %c7 = arith.constant 7 : index
    %c0_42 = arith.constant 0 : index
    %c0_43 = arith.constant 0 : index
    %49 = vector.load %arg1[%c7, %c0_42, %c0_43] : memref<8x16x32xf32, #tpu.memory_space<vmem>>, vector<1x16x32xf32>
    %50 = vector.shape_cast %49 : vector<1x16x32xf32> to vector<16x32xf32>
    %51 = arith.truncf %50 : vector<16x32xf32> to vector<16x32xbf16>
    %c0_44 = arith.constant 0 : index
    %c0_45 = arith.constant 0 : index
    %52 = vector.load %arg2[%c0_44, %c0_45] : memref<32x256xbf16, #tpu.memory_space<vmem>>, vector<32x256xbf16>
    %cst_46 = arith.constant dense<0.000000e+00> : vector<16x256xf32>
    %53 = tpu.matmul %51, %52, %cst_46 {dimension_numbers = #tpu.dot_dimension_numbers<[1], [0], [0], [1], [0, 0, 1, 1], [], []>} : vector<16x32xbf16>, vector<32x256xbf16>, vector<16x256xf32> -> vector<16x256xf32>
    %54 = arith.truncf %53 : vector<16x256xf32> to vector<16x256xbf16>
    %c0_47 = arith.constant 0 : index
    %c1792 = arith.constant 1792 : index
    %55 = vector.load %arg10[%c0_47, %c1792] : memref<16x2048xbf16, #tpu.memory_space<vmem>>, vector<16x256xbf16>
    tpu.vector_store %arg10[%c0_47, %c1792], %54 {strides = array<i32>} : memref<16x2048xbf16, #tpu.memory_space<vmem>>, vector<16x256xbf16>,
    %c0_48 = arith.constant 0 : index
    %c0_49 = arith.constant 0 : index
    %56 = vector.load %arg10[%c0_48, %c0_49] : memref<16x2048xbf16, #tpu.memory_space<vmem>>, vector<16x2048xbf16>
    %c0_50 = arith.constant 0 : index
    %c0_51 = arith.constant 0 : index
    %57 = vector.load %arg3[%c0_50, %c0_51] : memref<2048x256xbf16, #tpu.memory_space<vmem>>, vector<2048x256xbf16>
    %cst_52 = arith.constant dense<0.000000e+00> : vector<16x256xf32>
    %58 = tpu.matmul %56, %57, %cst_52 {dimension_numbers = #tpu.dot_dimension_numbers<[1], [0], [0], [1], [0, 0, 1, 1], [], []>} : vector<16x2048xbf16>, vector<2048x256xbf16>, vector<16x256xf32> -> vector<16x256xf32>
    %c0_53 = arith.constant 0 : index
    %c0_54 = arith.constant 0 : index
    %59 = vector.load %arg4[%c0_53, %c0_54] : memref<1x256xf32, #tpu.memory_space<vmem>>, vector<1x256xf32>
    %60 = vector.broadcast %59 : vector<1x256xf32> to vector<16x256xf32>
    %61 = arith.addf %58, %60 : vector<16x256xf32>
    %62 = math.tanh %61 : vector<16x256xf32>
    %63 = arith.truncf %62 : vector<16x256xf32> to vector<16x256xbf16>
    %c0_55 = arith.constant 0 : index
    %c0_56 = arith.constant 0 : index
    %64 = vector.load %arg5[%c0_55, %c0_56] : memref<256x256xbf16, #tpu.memory_space<vmem>>, vector<256x256xbf16>
    %cst_57 = arith.constant dense<0.000000e+00> : vector<16x256xf32>
    %65 = tpu.matmul %63, %64, %cst_57 {dimension_numbers = #tpu.dot_dimension_numbers<[1], [0], [0], [1], [0, 0, 1, 1], [], []>} : vector<16x256xbf16>, vector<256x256xbf16>, vector<16x256xf32> -> vector<16x256xf32>
    %c0_58 = arith.constant 0 : index
    %c0_59 = arith.constant 0 : index
    %66 = vector.load %arg6[%c0_58, %c0_59] : memref<1x256xf32, #tpu.memory_space<vmem>>, vector<1x256xf32>
    %67 = vector.broadcast %66 : vector<1x256xf32> to vector<16x256xf32>
    %68 = arith.addf %65, %67 : vector<16x256xf32>
    %69 = math.tanh %68 : vector<16x256xf32>
    %70 = arith.truncf %69 : vector<16x256xf32> to vector<16x256xbf16>
    %c0_60 = arith.constant 0 : index
    %c0_61 = arith.constant 0 : index
    %71 = vector.load %arg7[%c0_60, %c0_61] : memref<256x128xbf16, #tpu.memory_space<vmem>>, vector<256x128xbf16>
    %cst_62 = arith.constant dense<0.000000e+00> : vector<16x128xf32>
    %72 = tpu.matmul %70, %71, %cst_62 {dimension_numbers = #tpu.dot_dimension_numbers<[1], [0], [0], [1], [0, 0, 1, 1], [], []>} : vector<16x256xbf16>, vector<256x128xbf16>, vector<16x128xf32> -> vector<16x128xf32>
    %c0_63 = arith.constant 0 : index
    %c0_64 = arith.constant 0 : index
    %73 = vector.load %arg8[%c0_63, %c0_64] : memref<1x128xf32, #tpu.memory_space<vmem>>, vector<1x128xf32>
    %74 = vector.broadcast %73 : vector<1x128xf32> to vector<16x128xf32>
    %75 = arith.addf %72, %74 : vector<16x128xf32>
    %76 = math.tanh %75 : vector<16x128xf32>
    %77 = math.exp %76 : vector<16x128xf32>
    %78 = tpu.iota {dimensions = array<i32: 1>} : vector<16x128xi32>
    %c8_i32 = arith.constant 8 : i32
    %79 = vector.broadcast %c8_i32 : i32 to vector<16x128xi32>
    %80 = arith.cmpi slt, %78, %79 : vector<16x128xi32>
    %cst_65 = arith.constant 0.000000e+00 : f32
    %81 = vector.broadcast %cst_65 : f32 to vector<16x128xf32>
    %82 = arith.select %80, %77, %81 : vector<16x128xi1>, vector<16x128xf32>
    %cst_66 = arith.constant dense<0.000000e+00> : vector<16xf32>
    %83 = vector.multi_reduction <add>, %82, %cst_66 [1] : vector<16x128xf32> to vector<16xf32>
    %84 = vector.shape_cast %83 : vector<16xf32> to vector<16x1xf32>
    %85 = vector.broadcast %84 : vector<16x1xf32> to vector<16x128xf32>
    %86 = arith.divf %82, %85 : vector<16x128xf32>
    %c0_67 = arith.constant 0 : index
    %c0_68 = arith.constant 0 : index
    %87 = vector.load %arg9[%c0_67, %c0_68] : memref<16x128xf32, #tpu.memory_space<vmem>>, vector<16x128xf32>
    tpu.vector_store %arg9[%c0_67, %c0_68], %86 {strides = array<i32>} : memref<16x128xf32, #tpu.memory_space<vmem>>, vector<16x128xf32>,
    return
  }
  func.func @transform_0(%arg0: i32) -> (i32, i32, i32) {
    %c0_i32 = arith.constant 0 : i32
    %c0_i32_0 = arith.constant 0 : i32
    %c0_i32_1 = arith.constant 0 : i32
    return %c0_i32, %arg0, %c0_i32_0 : i32, i32, i32
  }
  func.func @transform_1(%arg0: i32) -> (i32, i32) {
    %c0_i32 = arith.constant 0 : i32
    %c0_i32_0 = arith.constant 0 : i32
    %c0_i32_1 = arith.constant 0 : i32
    return %c0_i32, %c0_i32_0 : i32, i32
  }
  func.func @transform_2(%arg0: i32) -> (i32, i32) {
    %c0_i32 = arith.constant 0 : i32
    %c0_i32_0 = arith.constant 0 : i32
    %c0_i32_1 = arith.constant 0 : i32
    return %c0_i32, %c0_i32_0 : i32, i32
  }
  func.func @transform_3(%arg0: i32) -> (i32, i32) {
    %c0_i32 = arith.constant 0 : i32
    %c0_i32_0 = arith.constant 0 : i32
    %c0_i32_1 = arith.constant 0 : i32
    return %c0_i32, %c0_i32_0 : i32, i32
  }
  func.func @transform_4(%arg0: i32) -> (i32, i32) {
    %c0_i32 = arith.constant 0 : i32
    %c0_i32_0 = arith.constant 0 : i32
    %c0_i32_1 = arith.constant 0 : i32
    return %c0_i32, %c0_i32_0 : i32, i32
  }
  func.func @transform_5(%arg0: i32) -> (i32, i32) {
    %c0_i32 = arith.constant 0 : i32
    %c0_i32_0 = arith.constant 0 : i32
    %c0_i32_1 = arith.constant 0 : i32
    return %c0_i32, %c0_i32_0 : i32, i32
  }
  func.func @transform_6(%arg0: i32) -> (i32, i32) {
    %c0_i32 = arith.constant 0 : i32
    %c0_i32_0 = arith.constant 0 : i32
    %c0_i32_1 = arith.constant 0 : i32
    return %c0_i32, %c0_i32_0 : i32, i32
  }
  func.func @transform_7(%arg0: i32) -> (i32, i32) {
    %c0_i32 = arith.constant 0 : i32
    %c0_i32_0 = arith.constant 0 : i32
    %c0_i32_1 = arith.constant 0 : i32
    return %c0_i32, %c0_i32_0 : i32, i32
  }
  func.func @transform_8(%arg0: i32) -> (i32, i32) {
    %c0_i32 = arith.constant 0 : i32
    %c0_i32_0 = arith.constant 0 : i32
    return %arg0, %c0_i32 : i32, i32
  }
}

</mosaic_0001>

<bundles_post_ra>
// kernel: tpu_custom_call.1
= control target key start
LH: loop header
LB: loop body
LE: loop exit
PB: predicated region body
PF: predicated region fallthrough
CT: control target
= control target key end

     0   :  { %13 = vsyncpa [#allocation4], 0  ;;  %s4462_s0 = inlined_call_operand.hbm [shape: f32[8,16,32], index: 0, kind: input, shape index: {}]   ;;  %s4463_s1 = inlined_call_operand.hbm [shape: bf16[32,256], index: 1, kind: input, shape index: {}]   ;;  %s4464_s2 = inlined_call_operand.hbm [shape: bf16[2048,256], index: 2, kind: input, shape index: {}]   ;;  %s4465_s3 = inlined_call_operand.vmem [shape: f32[1,256], index: 3, kind: input, shape index: {}]   ;;  %s4466_s4 = inlined_call_operand.hbm [shape: bf16[256,256], index: 4, kind: input, shape index: {}]   ;;  %s4467_s5 = inlined_call_operand.vmem [shape: f32[1,256], index: 5, kind: input, shape index: {}]   ;;  %s4468_s6 = inlined_call_operand.hbm [shape: bf16[256,128], index: 6, kind: input, shape index: {}]   ;;  %s4469_s7 = inlined_call_operand.vmem [shape: f32[1,128], index: 7, kind: input, shape index: {}]   ;;  %s4470_s8 = inlined_call_operand.hbm [shape: f32[16,128], index: 8, kind: output, shape index: {}]  }
   0x1   :  { %14 = vsyncpa [#allocation7], 0 }
   0x2   :  { %15 = vsyncpa [#allocation10], 0 }
   0x3   :  { %16 = vsyncpa [#allocation5], 0  ;;  %s4138_s27 = smov [#allocation6]   ;;  %s4139_s29 = smov [#allocation9]  }
   0x4   :  { %s34_s28 = sshll.u32 %s4138_s27, 4  ;;  %s60_s30 = sshll.u32 %s4139_s29, 4  ;;  %s35_s28 = int_to_ptr.vmem [resolvable:$true] %s34_s28  ;;  %s4194_s30 = int_to_ptr.vmem [resolvable:$true] %s60_s30 }
   0x5   :  { %s3998_s11 = scalar_lea.hbm %s4463_s1, 512 }
   0x6   :  { %p3999_p0 = scmp.ne.s32.totalorder %s4463_s1, %s3998_s11  ;;  %p4002_p1 = scmp.lt.u32.totalorder %s3998_s11, %s4463_s1 }
   0x8   :  { %p4004_p2 = pnand %p4002_p1, %p3999_p0 }
   0xa   :  { %4007 = shalt.err (!%p4004_p2)
}
   0xb   :  { %s4008_s16 = scalar_lea.vmem %s35_s28, 512  ;;  %p4013_p4 = scmp.lt.s32.totalorder %s35_s28, %s35_s28 }
   0xc   :  { %p4009_p3 = scmp.ne.s32.totalorder %s35_s28, %s4008_s16  ;;  %p4014_p5 = scmp.lt.s32.totalorder %s4008_s16, %s4008_s16 }
   0xe   :  { %p4015_p6 = por %p4014_p5, %p4013_p4 }
  0x10   :  { %p4016_p7 = pnand %p4015_p6, %p4009_p3 }
  0x12   :  { %4019 = shalt.err (!%p4016_p7)
}
  0x13   :  { %s4140_s17 = smov 128   ;;  %s4141_s18 = smov 8  }
  0x14   :  { %40 = dma.hbm_to_vmem [thread:$0]  %s4463_s1, 512, %s35_s28, [#allocation7], %s4140_s17, %s4140_s17, %s4141_s18  }
  0x15   :  { %s4020_s23 = scalar_lea.hbm %s4466_s4, 4096 }
  0x16   :  { %p4021_p8 = scmp.ne.s32.totalorder %s4466_s4, %s4020_s23  ;;  %p4024_p9 = scmp.lt.u32.totalorder %s4020_s23, %s4466_s4 }
  0x18   :  { %p4026_p10 = pnand %p4024_p9, %p4021_p8 }
  0x1a   :  { %4029 = shalt.err (!%p4026_p10)
}
  0x1b   :  { %s4030_s29 = scalar_lea.vmem %s4194_s30, 4096  ;;  %p4035_p12 = scmp.lt.s32.totalorder %s4194_s30, %s4194_s30 }
  0x1c   :  { %p4031_p11 = scmp.ne.s32.totalorder %s4194_s30, %s4030_s29  ;;  %p4036_p13 = scmp.lt.s32.totalorder %s4030_s29, %s4030_s29 }
  0x1e   :  { %p4037_p0 = por %p4036_p13, %p4035_p12 }
  0x20   :  { %p4038_p1 = pnand %p4037_p0, %p4031_p11 }
  0x22   :  { %4041 = shalt.err (!%p4038_p1)
}
  0x23   :  { %66 = dma.hbm_to_vmem [thread:$0]  %s4466_s4, 4096, %s4194_s30, [#allocation10], %s4140_s17, %s4140_s17, %s4141_s18  }
  0x24   :  { %s4142_s9 = smov [#allocation3]   ;;  %s4143_s11 = smov [#allocation8]  }
  0x25   :  { %s22_s10 = sshll.u32 %s4142_s9, 4  ;;  %s46_s12 = sshll.u32 %s4143_s11, 4  ;;  %s23_s10 = int_to_ptr.vmem [resolvable:$true] %s22_s10  ;;  %s4231_s12 = int_to_ptr.vmem [resolvable:$true] %s46_s12 }
  0x26   :  { %s4042_s15 = scalar_lea.hbm %s4462_s0, 2048 }
  0x27   :  { %p4043_p2 = scmp.ne.s32.totalorder %s4462_s0, %s4042_s15  ;;  %p4046_p3 = scmp.lt.u32.totalorder %s4042_s15, %s4462_s0 }
  0x29   :  { %p4048_p4 = pnand %p4046_p3, %p4043_p2 }
  0x2b   :  { %4051 = shalt.err (!%p4048_p4)
}
  0x2c   :  { %s4052_s4 = scalar_lea.vmem %s23_s10, 2048  ;;  %p4057_p6 = scmp.lt.s32.totalorder %s23_s10, %s23_s10 }
  0x2d   :  { %p4053_p5 = scmp.ne.s32.totalorder %s23_s10, %s4052_s4  ;;  %p4058_p7 = scmp.lt.s32.totalorder %s4052_s4, %s4052_s4 }
  0x2f   :  { %p4059_p8 = por %p4058_p7, %p4057_p6 }
  0x31   :  { %p4060_p9 = pnand %p4059_p8, %p4053_p5 }
  0x33   :  { %4063 = shalt.err (!%p4060_p9)
}
  0x34   :  { %28 = dma.hbm_to_vmem [thread:$0]  %s4462_s0, 2048, %s23_s10, [#allocation4], %s4140_s17, %s4140_s17, %s4141_s18  }
  0x35   :  { %s4064_s25 = scalar_lea.hbm %s4464_s2, 32768 }
  0x36   :  { %p4065_p10 = scmp.ne.s32.totalorder %s4464_s2, %s4064_s25  ;;  %p4068_p11 = scmp.lt.u32.totalorder %s4064_s25, %s4464_s2 }
  0x38   :  { %p4070_p12 = pnand %p4068_p11, %p4065_p10 }
  0x3a   :  { %4073 = shalt.err (!%p4070_p12)
}
  0x3b   :  { %s4074_s28 = scalar_lea.vmem %s4231_s12, 32768  ;;  %p4079_p0 = scmp.lt.s32.totalorder %s4231_s12, %s4231_s12 }
  0x3c   :  { %p4075_p13 = scmp.ne.s32.totalorder %s4231_s12, %s4074_s28  ;;  %p4080_p1 = scmp.lt.s32.totalorder %s4074_s28, %s4074_s28 }
  0x3e   :  { %p4081_p2 = por %p4080_p1, %p4079_p0 }
  0x40   :  { %p4082_p3 = pnand %p4081_p2, %p4075_p13 }
  0x42   :  { %4085 = shalt.err (!%p4082_p3)
}
  0x43   :  { %52 = dma.hbm_to_vmem [thread:$0]  %s4464_s2, 32768, %s4231_s12, [#allocation7], %s4140_s17, %s4140_s17, %s4141_s18  }
  0x44   :  { %s4144_s10 = smov [#allocation11]   ;;  %s4086_s15 = scalar_lea.hbm %s4468_s6, 2048 }
  0x45   :  { %s74_s11 = sshll.u32 %s4144_s10, 4  ;;  %p4087_p4 = scmp.ne.s32.totalorder %s4468_s6, %s4086_s15  ;;  %s75_s11 = int_to_ptr.vmem [resolvable:$true] %s74_s11 }
  0x46   :  { %p4090_p5 = scmp.lt.u32.totalorder %s4086_s15, %s4468_s6 }
  0x48   :  { %p4092_p6 = pnand %p4090_p5, %p4087_p4 }
  0x4a   :  { %4095 = shalt.err (!%p4092_p6)
}
  0x4b   :  { %s4096_s4 = scalar_lea.vmem %s75_s11, 2048  ;;  %p4101_p8 = scmp.lt.s32.totalorder %s75_s11, %s75_s11 }
  0x4c   :  { %p4097_p7 = scmp.ne.s32.totalorder %s75_s11, %s4096_s4  ;;  %p4102_p9 = scmp.lt.s32.totalorder %s4096_s4, %s4096_s4 }
  0x4e   :  { %p4103_p10 = por %p4102_p9, %p4101_p8 }
  0x50   :  { %p4104_p11 = pnand %p4103_p10, %p4097_p7 }
  0x52   :  { %4107 = shalt.err (!%p4104_p11)
}
  0x53   :  { %s4145_s2 = smov 64   ;;  %s4146_s12 = smov 4  }
  0x54   :  { %80 = dma.hbm_to_vmem [thread:$0]  %s4468_s6, 2048, %s75_s11, [#allocation10], %s4145_s2, %s4145_s2, %s4146_s12  }
  0x55   :  { %4130 = dma.done.wait [#allocation4], 2048  }
  0x56   :  { %4131 = vsyncadd [#allocation4], 4294965248 }
  0x57   :  { %4132 = dma.done.wait [#allocation7], 33280  }
  0x58   :  { %4133 = vsyncadd [#allocation7], 4294934016 }
  0x59   :  { %4134 = dma.done.wait [#allocation10], 6144  }
  0x5a   :  { %4135 = vsyncadd [#allocation10], 4294961152  ;;  %v4147_v0 = vmov 0   ;;  %v4282_v1 = vld [vmem:[#allocation6 + $0x4] ss:$8 sps:$4 sm:$0xff]   ;;  %vm126_vm0 = vcmask 261120  }
  0x5b   :  { %162 = vmatprep.mubr.bf16.mxu1 %v4147_v0  ;;  %474 = vmatprep.mubr.bf16.mxu0 %v4147_v0  ;;  %v4284_v2 = vld [vmem:[#allocation6] ss:$8 sps:$4 sm:$0xff]   ;;  %v4287_v3 = vld [vmem:[#allocation6 + $0x14] ss:$8 sps:$4 sm:$0xff]   ;;  %v4291_v4 = vld [vmem:[#allocation6 + $0x10] ss:$8 sps:$4 sm:$0xff]  }
  0x5c   :  { %130 = vmatprep.subr.bf16.mxu1 %v4282_v1  ;;  %442 = vmatprep.subr.bf16.mxu0 %v4282_v1  ;;  %v99_v5 = vld [vmem:[#allocation3] sm:$0xff]  ;;  %v100_v6 = vld [vmem:[#allocation3 + $0x8] sm:$0xff]  ;;  %v178_v11 = vld [vmem:[#allocation3 + $0x10] sm:$0xff] }
  0x5d   :  { %131 = vmatpush1.bf16.msra.mxu1 %v4284_v2  ;;  %443 = vmatpush1.bf16.msra.mxu0 %v4284_v2  ;;  %v412_v7 = vld [vmem:[#allocation3 + $0x40] sm:$0xff]  ;;  %v413_v8 = vld [vmem:[#allocation3 + $0x48] sm:$0xff]  ;;  %v101_v9 = vpack.c.bf16 %v100_v6, %v99_v5  ;;  %v179_v12 = vld [vmem:[#allocation3 + $0x18] sm:$0xff] }
  0x5e   :  { %132 = vmatprep.subr.bf16.mxu1 %v4287_v3  ;;  %444 = vmatprep.subr.bf16.mxu0 %v4287_v3  ;;  %v414_v10 = vpack.c.bf16 %v413_v8, %v412_v7  ;;  %v180_v13 = vpack.c.bf16 %v179_v12, %v178_v11  ;;  %v568_v14 = vld [vmem:[#allocation3 + $0x60] sm:$0xff]  ;;  %v569_v15 = vld [vmem:[#allocation3 + $0x68] sm:$0xff]  ;;  %v3551_v21 = vld [vmem:[#allocation8 + $0x314] ss:$8 sps:$4 sm:$0xff]  }
  0x5f   :  { %v570_v16 = vpack.c.bf16 %v569_v15, %v568_v14  ;;  %v3543_v17 = vld [vmem:[#allocation8 + $0x300] ss:$8 sps:$4 sm:$0xff]   ;;  %v3545_v18 = vld [vmem:[#allocation8 + $0x304] ss:$8 sps:$4 sm:$0xff]   ;;  %v3549_v23 = vld [vmem:[#allocation8 + $0x310] ss:$8 sps:$4 sm:$0xff]  }
  0x60   :  { %v256_v19 = vld [vmem:[#allocation3 + $0x20] sm:$0xff]  ;;  %v257_v20 = vld [vmem:[#allocation3 + $0x28] sm:$0xff]  ;;  %v334_v25 = vld [vmem:[#allocation3 + $0x30] sm:$0xff] }
  0x61   :  { %133 = vmatpush1.bf16.msra.mxu1 %v4291_v4  ;;  %445 = vmatpush1.bf16.msra.mxu0 %v4291_v4  ;;  %v258_v22 = vpack.c.bf16 %v257_v20, %v256_v19  ;;  %v3557_v24 = vld [vmem:[#allocation8 + $0x324] ss:$8 sps:$4 sm:$0xff]   ;;  %v3555_v26 = vld [vmem:[#allocation8 + $0x320] ss:$8 sps:$4 sm:$0xff]   ;;  %v335_v27 = vld [vmem:[#allocation3 + $0x38] sm:$0xff] }
  0x62   :  { %208 = vmatprep.subr.bf16.mxu1 %v4282_v1  ;;  %598 = vmatprep.subr.bf16.mxu0 %v4282_v1  ;;  %v3563_v28 = vld [vmem:[#allocation8 + $0x334] ss:$8 sps:$4 sm:$0xff]   ;;  %v336_v29 = vpack.c.bf16 %v335_v27, %v334_v25  ;;  %v3561_v30 = vld [vmem:[#allocation8 + $0x330] ss:$8 sps:$4 sm:$0xff]   ;;  %v3569_v31 = vld [vmem:[#allocation8 + $0x344] ss:$8 sps:$4 sm:$0xff]  }
  0x63   :  { %v490_v32 = vld [vmem:[#allocation3 + $0x50] sm:$0xff]  ;;  %v3567_v33 = vld [vmem:[#allocation8 + $0x340] ss:$8 sps:$4 sm:$0xff]   ;;  %v491_v34 = vld [vmem:[#allocation3 + $0x58] sm:$0xff] }
  0x64   :  { %3110 = vmatmul.mubr.msk.bf16.vlgmr.msra.gmra.mrb[0].mxu1 %vm126_vm0, %v101_v9  ;;  %3130 = vmatmul.mubr.msk.bf16.vlgmr.msra.gmra.mrb[0].mxu0 %vm126_vm0, %v414_v10  ;;  %v3575_v35 = vld [vmem:[#allocation8 + $0x354] ss:$8 sps:$4 sm:$0xff]   ;;  %v492_v36 = vpack.c.bf16 %v491_v34, %v490_v32  ;;  %v3573_v37 = vld [vmem:[#allocation8 + $0x350] ss:$8 sps:$4 sm:$0xff]   ;;  %v3581_v38 = vld [vmem:[#allocation8 + $0x364] ss:$8 sps:$4 sm:$0xff]  }
  0x65   :  { %209 = vmatpush1.bf16.msra.mxu1 %v4284_v2  ;;  %240 = vmatprep.mubr.bf16.mxu1 %v4147_v0  ;;  %v3579_v39 = vld [vmem:[#allocation8 + $0x360] ss:$8 sps:$4 sm:$0xff]   ;;  %v646_v40 = vld [vmem:[#allocation3 + $0x70] sm:$0xff]  ;;  %v647_v41 = vld [vmem:[#allocation3 + $0x78] sm:$0xff] }
  0x66   :  { %210 = vmatprep.subr.bf16.mxu1 %v4287_v3  ;;  %599 = vmatpush1.bf16.msra.mxu0 %v4284_v2  ;;  %v3587_v42 = vld [vmem:[#allocation8 + $0x374] ss:$8 sps:$4 sm:$0xff]   ;;  %v3524_v43 = vld [vmem:[#allocation8 + $0x4] ss:$8 sps:$4 sm:$0xff]   ;;  %v3585_v44 = vld [vmem:[#allocation8 + $0x370] ss:$8 sps:$4 sm:$0xff]   ;;  %v648_v47 = vpack.c.bf16 %v647_v41, %v646_v40 }
  0x67   :  { %600 = vmatprep.subr.bf16.mxu0 %v4287_v3  ;;  %630 = vmatprep.mubr.bf16.mxu0 %v4147_v0  ;;  %v3522_v45 = vld [vmem:[#allocation8] ss:$8 sps:$4 sm:$0xff]   ;;  %v3593_v46 = vld [vmem:[#allocation8 + $0x384] ss:$8 sps:$4 sm:$0xff]   ;;  %v3527_v48 = vld [vmem:[#allocation8 + $0x14] ss:$8 sps:$4 sm:$0xff]  }
  0x68   :  { %v3591_v49 = vld [vmem:[#allocation8 + $0x380] ss:$8 sps:$4 sm:$0xff]   ;;  %v3525_v50 = vld [vmem:[#allocation8 + $0x10] ss:$8 sps:$4 sm:$0xff]   ;;  %v3530_v51 = vld [vmem:[#allocation8 + $0x24] ss:$8 sps:$4 sm:$0xff]  }
  0x69   :  { %211 = vmatpush1.bf16.msra.mxu1 %v4291_v4  ;;  %v3528_v52 = vld [vmem:[#allocation8 + $0x20] ss:$8 sps:$4 sm:$0xff]   ;;  %v3533_v53 = vld [vmem:[#allocation8 + $0x34] ss:$8 sps:$4 sm:$0xff]   ;;  %v3531_v54 = vld [vmem:[#allocation8 + $0x30] ss:$8 sps:$4 sm:$0xff]  }
  0x6a   :  { %286 = vmatprep.subr.bf16.mxu1 %v4282_v1  ;;  %601 = vmatpush1.bf16.msra.mxu0 %v4291_v4  ;;  %v3536_v55 = vld [vmem:[#allocation8 + $0x44] ss:$8 sps:$4 sm:$0xff]   ;;  %v3534_v56 = vld [vmem:[#allocation8 + $0x40] ss:$8 sps:$4 sm:$0xff]   ;;  %v3539_v57 = vld [vmem:[#allocation8 + $0x54] ss:$8 sps:$4 sm:$0xff]  }
  0x6b   :  { %2416 = vmatprep.subr.bf16.mxu0 %v3545_v18  ;;  %v3537_v58 = vld [vmem:[#allocation8 + $0x50] ss:$8 sps:$4 sm:$0xff]   ;;  %v3542_v59 = vld [vmem:[#allocation8 + $0x64] ss:$8 sps:$4 sm:$0xff]   ;;  %v3540_v60 = vld [vmem:[#allocation8 + $0x60] ss:$8 sps:$4 sm:$0xff]  }
  0x6c   :  { %3115 = vmatmul.mubr.msk.bf16.vlgmr.msra.gmra.mrb[4].mxu1 %vm126_vm0, %v180_v13  ;;  %v3548_v61 = vld [vmem:[#allocation8 + $0x74] ss:$8 sps:$4 sm:$0xff]   ;;  %v3546_v62 = vld [vmem:[#allocation8 + $0x70] ss:$8 sps:$4 sm:$0xff]   ;;  %v3554_v63 = vld [vmem:[#allocation8 + $0x84] ss:$8 sps:$4 sm:$0xff]  }
  0x6d   :  { %287 = vmatpush1.bf16.msra.mxu1 %v4284_v2  ;;  %318 = vmatprep.mubr.bf16.mxu1 %v4147_v0  ;;  %v3572_v5 = vld [vmem:[#allocation8 + $0xb4] ss:$8 sps:$4 sm:$0xff]   ;;  %v3570_v6 = vld [vmem:[#allocation8 + $0xb0] ss:$8 sps:$4 sm:$0xff]   ;;  %v3578_v7 = vld [vmem:[#allocation8 + $0xc4] ss:$8 sps:$4 sm:$0xff]  }
  0x6e   :  { %288 = vmatprep.subr.bf16.mxu1 %v4287_v3  ;;  %3140 = vmatmul.mubr.msk.bf16.vlgmr.msra.gmra.mrb[4].mxu0 %vm126_vm0, %v570_v16  ;;  %v3576_v8 = vld [vmem:[#allocation8 + $0xc0] ss:$8 sps:$4 sm:$0xff]   ;;  %v3599_v9 = vld [vmem:[#allocation8 + $0x394] ss:$8 sps:$4 sm:$0xff]   ;;  %v3597_v11 = vld [vmem:[#allocation8 + $0x390] ss:$8 sps:$4 sm:$0xff]  }
  0x6f   :  { %2417 = vmatpush1.bf16.msra.mxu0 %v3543_v17  ;;  %v3584_v10 = vld [vmem:[#allocation8 + $0xd4] ss:$8 sps:$4 sm:$0xff]   ;;  %v3582_v12 = vld [vmem:[#allocation8 + $0xd0] ss:$8 sps:$4 sm:$0xff]   ;;  %v3605_v13 = vld [vmem:[#allocation8 + $0x3a4] ss:$8 sps:$4 sm:$0xff]  }
  0x70   :  { %2418 = vmatprep.subr.bf16.mxu0 %v3551_v21  ;;  %v3590_v14 = vld [vmem:[#allocation8 + $0xe4] ss:$8 sps:$4 sm:$0xff]   ;;  %v3603_v15 = vld [vmem:[#allocation8 + $0x3a0] ss:$8 sps:$4 sm:$0xff]   ;;  %v3611_v17 = vld [vmem:[#allocation8 + $0x3b4] ss:$8 sps:$4 sm:$0xff]  }
  0x71   :  { %289 = vmatpush1.bf16.msra.mxu1 %v4291_v4  ;;  %v3588_v16 = vld [vmem:[#allocation8 + $0xe0] ss:$8 sps:$4 sm:$0xff]   ;;  %v3596_v18 = vld [vmem:[#allocation8 + $0xf4] ss:$8 sps:$4 sm:$0xff]   ;;  %v3609_v19 = vld [vmem:[#allocation8 + $0x3b0] ss:$8 sps:$4 sm:$0xff]  }
  0x72   :  { %364 = vmatprep.subr.bf16.mxu1 %v4282_v1  ;;  %v3594_v20 = vld [vmem:[#allocation8 + $0xf0] ss:$8 sps:$4 sm:$0xff]   ;;  %v3602_v21 = vld [vmem:[#allocation8 + $0x104] ss:$8 sps:$4 sm:$0xff]  }
  0x73   :  { %2419 = vmatpush1.bf16.msra.mxu0 %v3549_v23  ;;  %v3615_v23 = vld [vmem:[#allocation8 + $0x3c0] ss:$8 sps:$4 sm:$0xff]   ;;  %v3621_v25 = vld [vmem:[#allocation8 + $0x3d0] ss:$8 sps:$4 sm:$0xff]   ;;  %v3629_v27 = vld [vmem:[#allocation8 + $0x3e4] ss:$8 sps:$4 sm:$0xff]  }
  0x74   :  { %3120 = vmatmul.mubr.msk.bf16.vlgmr.msra.gmra.mrb[8].mxu1 %vm126_vm0, %v258_v22  ;;  %2420 = vmatprep.subr.bf16.mxu0 %v3557_v24  ;;  %v3617_v22 = vld [vmem:[#allocation8 + $0x3c4] ss:$8 sps:$4 sm:$0xff]   ;;  %v3623_v24 = vld [vmem:[#allocation8 + $0x3d4] ss:$8 sps:$4 sm:$0xff]  }
  0x75   :  { %365 = vmatpush1.bf16.msra.mxu1 %v4284_v2  ;;  %396 = vmatprep.mubr.bf16.mxu1 %v4147_v0 }
  0x76   :  { %366 = vmatprep.subr.bf16.mxu1 %v4287_v3 }
  0x77   :  { %2421 = vmatpush1.bf16.msra.mxu0 %v3555_v26  ;;  %v3627_v26 = vld [vmem:[#allocation8 + $0x3e0] ss:$8 sps:$4 sm:$0xff]  }
  0x78   :  { %2422 = vmatprep.subr.bf16.mxu0 %v3563_v28  ;;  %v3635_v28 = vld [vmem:[#allocation8 + $0x3f4] ss:$8 sps:$4 sm:$0xff]  }
  0x79   :  { %367 = vmatpush1.bf16.msra.mxu1 %v4291_v4 }
  0x7a   :  { %520 = vmatprep.subr.bf16.mxu1 %v4282_v1 }
  0x7b   :  { %2423 = vmatpush1.bf16.msra.mxu0 %v3561_v30  ;;  %v3641_v30 = vld [vmem:[#allocation8 + $0x404] ss:$8 sps:$4 sm:$0xff]  }
  0x7c   :  { %3125 = vmatmul.mubr.msk.bf16.vlgmr.msra.gmra.mrb[12].mxu1 %vm126_vm0, %v336_v29  ;;  %2424 = vmatprep.subr.bf16.mxu0 %v3569_v31  ;;  %v3633_v29 = vld [vmem:[#allocation8 + $0x3f0] ss:$8 sps:$4 sm:$0xff]  }
  0x7d   :  { %521 = vmatpush1.bf16.msra.mxu1 %v4284_v2  ;;  %552 = vmatprep.mubr.bf16.mxu1 %v4147_v0 }
  0x7e   :  { %522 = vmatprep.subr.bf16.mxu1 %v4287_v3 }
  0x7f   :  { %2425 = vmatpush1.bf16.msra.mxu0 %v3567_v33 }
  0x80   :  { %2426 = vmatprep.subr.bf16.mxu0 %v3575_v35 }
  0x81   :  { %523 = vmatpush1.bf16.msra.mxu1 %v4291_v4 }
  0x82   :  { %676 = vmatprep.subr.bf16.mxu1 %v4282_v1  ;;  %v3560_v1 = vld [vmem:[#allocation8 + $0x94] ss:$8 sps:$4 sm:$0xff]  }
  0x83   :  { %2427 = vmatpush1.bf16.msra.mxu0 %v3573_v37 }
  0x84   :  { %3135 = vmatmul.mubr.msk.bf16.vlgmr.msra.gmra.mrb[16].mxu1 %vm126_vm0, %v492_v36  ;;  %2428 = vmatprep.subr.bf16.mxu0 %v3581_v38 }
  0x85   :  { %677 = vmatpush1.bf16.msra.mxu1 %v4284_v2  ;;  %708 = vmatprep.mubr.bf16.mxu1 %v4147_v0  ;;  %v3552_v0 = vld [vmem:[#allocation8 + $0x80] ss:$8 sps:$4 sm:$0xff]   ;;  %v3558_v2 = vld [vmem:[#allocation8 + $0x90] ss:$8 sps:$4 sm:$0xff]  }
  0x86   :  { %678 = vmatprep.subr.bf16.mxu1 %v4287_v3  ;;  %v3566_v3 = vld [vmem:[#allocation8 + $0xa4] ss:$8 sps:$4 sm:$0xff]  }
  0x87   :  { %2429 = vmatpush1.bf16.msra.mxu0 %v3579_v39 }
  0x88   :  { %2430 = vmatprep.subr.bf16.mxu0 %v3587_v42  ;;  %v3600_v42 = vld [vmem:[#allocation8 + $0x100] ss:$8 sps:$4 sm:$0xff]  }
  0x89   :  { %679 = vmatpush1.bf16.msra.mxu1 %v4291_v4  ;;  %v3564_v4 = vld [vmem:[#allocation8 + $0xa0] ss:$8 sps:$4 sm:$0xff]  }
  0x8a   :  { %2287 = vmatprep.subr.bf16.mxu1 %v3524_v43 }
  0x8b   :  { %2431 = vmatpush1.bf16.msra.mxu0 %v3585_v44  ;;  %v3608_v44 = vld [vmem:[#allocation8 + $0x114] ss:$8 sps:$4 sm:$0xff]  }
  0x8c   :  { %3145 = vmatmul.mubr.msk.bf16.vlgmr.msra.gmra.mrb[20].mxu1 %vm126_vm0, %v648_v47  ;;  %2432 = vmatprep.subr.bf16.mxu0 %v3593_v46  ;;  %v3606_v46 = vld [vmem:[#allocation8 + $0x110] ss:$8 sps:$4 sm:$0xff]  }
  0x8d   :  { %2288 = vmatpush1.bf16.msra.mxu1 %v3522_v45 }
  0x8e   :  { %2289 = vmatprep.subr.bf16.mxu1 %v3527_v48  ;;  %v3614_v48 = vld [vmem:[#allocation8 + $0x124] ss:$8 sps:$4 sm:$0xff]  }
  0x8f   :  { %2433 = vmatpush1.bf16.msra.mxu0 %v3591_v49 }
  0x90   :  { %2434 = vmatprep.subr.bf16.mxu0 %v3599_v9  ;;  %v3636_v9 = vld [vmem:[#allocation8 + $0x160] ss:$8 sps:$4 sm:$0xff]  }
  0x91   :  { %2290 = vmatpush1.bf16.msra.mxu1 %v3525_v50 }
  0x92   :  { %2291 = vmatprep.subr.bf16.mxu1 %v3530_v51 }
  0x93   :  { %2435 = vmatpush1.bf16.msra.mxu0 %v3597_v11  ;;  %v3644_v11 = vld [vmem:[#allocation8 + $0x174] ss:$8 sps:$4 sm:$0xff]  }
  0x94   :  { %2436 = vmatprep.subr.bf16.mxu0 %v3605_v13  ;;  %v3642_v13 = vld [vmem:[#allocation8 + $0x170] ss:$8 sps:$4 sm:$0xff]  }
  0x95   :  { %2292 = vmatpush1.bf16.msra.mxu1 %v3528_v52 }
  0x96   :  { %2293 = vmatprep.subr.bf16.mxu1 %v3533_v53  ;;  %v3612_v53 = vld [vmem:[#allocation8 + $0x120] ss:$8 sps:$4 sm:$0xff]  }
  0x97   :  { %2437 = vmatpush1.bf16.msra.mxu0 %v3603_v15 }
  0x98   :  { %2438 = vmatprep.subr.bf16.mxu0 %v3611_v17  ;;  %v3653_v17 = vld [vmem:[#allocation8 + $0x424] ss:$8 sps:$4 sm:$0xff]  }
  0x99   :  { %2294 = vmatpush1.bf16.msra.mxu1 %v3531_v54  ;;  %v3620_v54 = vld [vmem:[#allocation8 + $0x134] ss:$8 sps:$4 sm:$0xff]  }
  0x9a   :  { %2295 = vmatprep.subr.bf16.mxu1 %v3536_v55 }
  0x9b   :  { %2439 = vmatpush1.bf16.msra.mxu0 %v3609_v19 }
  0x9c   :  { %2440 = vmatprep.subr.bf16.mxu0 %v3617_v22  ;;  %v3648_v22 = vld [vmem:[#allocation8 + $0x180] ss:$8 sps:$4 sm:$0xff]  }
  0x9d   :  { %2296 = vmatpush1.bf16.msra.mxu1 %v3534_v56  ;;  %v3618_v56 = vld [vmem:[#allocation8 + $0x130] ss:$8 sps:$4 sm:$0xff]  }
  0x9e   :  { %2297 = vmatprep.subr.bf16.mxu1 %v3539_v57 }
  0x9f   :  { %2441 = vmatpush1.bf16.msra.mxu0 %v3615_v23  ;;  %v3651_v23 = vld [vmem:[#allocation8 + $0x420] ss:$8 sps:$4 sm:$0xff]  }
  0xa0   :  { %2442 = vmatprep.subr.bf16.mxu0 %v3623_v24 }
  0xa1   :  { %2298 = vmatpush1.bf16.msra.mxu1 %v3537_v58  ;;  %v3626_v58 = vld [vmem:[#allocation8 + $0x144] ss:$8 sps:$4 sm:$0xff]  }
  0xa2   :  { %2299 = vmatprep.subr.bf16.mxu1 %v3542_v59 }
  0xa3   :  { %2443 = vmatpush1.bf16.msra.mxu0 %v3621_v25  ;;  %v3656_v25 = vld [vmem:[#allocation8 + $0x194] ss:$8 sps:$4 sm:$0xff]  }
  0xa4   :  { %2444 = vmatprep.subr.bf16.mxu0 %v3629_v27  ;;  %v3654_v27 = vld [vmem:[#allocation8 + $0x190] ss:$8 sps:$4 sm:$0xff]  }
  0xa5   :  { %2300 = vmatpush1.bf16.msra.mxu1 %v3540_v60 }
  0xa6   :  { %2301 = vmatprep.subr.bf16.mxu1 %v3548_v61 }
  0xa7   :  { %2445 = vmatpush1.bf16.msra.mxu0 %v3627_v26  ;;  %v3659_v26 = vld [vmem:[#allocation8 + $0x434] ss:$8 sps:$4 sm:$0xff]  }
  0xa8   :  { %2446 = vmatprep.subr.bf16.mxu0 %v3635_v28  ;;  %v3657_v28 = vld [vmem:[#allocation8 + $0x430] ss:$8 sps:$4 sm:$0xff]  }
  0xa9   :  { %2302 = vmatpush1.bf16.msra.mxu1 %v3546_v62 }
  0xaa   :  { %2303 = vmatprep.subr.bf16.mxu1 %v3554_v63  ;;  %v3624_v63 = vld [vmem:[#allocation8 + $0x140] ss:$8 sps:$4 sm:$0xff]  }
  0xab   :  { %2447 = vmatpush1.bf16.msra.mxu0 %v3633_v29  ;;  %v3662_v29 = vld [vmem:[#allocation8 + $0x1a4] ss:$8 sps:$4 sm:$0xff]  }
  0xac   :  { %2459 = vmatprep.subr.bf16.mxu0 %v3641_v30  ;;  %v3665_v30 = vld [vmem:[#allocation8 + $0x444] ss:$8 sps:$4 sm:$0xff]  }
  0xad   :  { %2304 = vmatpush1.bf16.msra.mxu1 %v3552_v0  ;;  %v3632_v0 = vld [vmem:[#allocation8 + $0x154] ss:$8 sps:$4 sm:$0xff]  }
  0xae   :  { %2305 = vmatprep.subr.bf16.mxu1 %v3560_v1 }
  0xb1   :  { %2306 = vmatpush1.bf16.msra.mxu1 %v3558_v2  ;;  %v3630_v2 = vld [vmem:[#allocation8 + $0x150] ss:$8 sps:$4 sm:$0xff]  }
  0xb2   :  { %2307 = vmatprep.subr.bf16.mxu1 %v3566_v3 }
  0xb5   :  { %2308 = vmatpush1.bf16.msra.mxu1 %v3564_v4  ;;  %v3638_v4 = vld [vmem:[#allocation8 + $0x164] ss:$8 sps:$4 sm:$0xff]  }
  0xb6   :  { %2309 = vmatprep.subr.bf16.mxu1 %v3572_v5 }
  0xb9   :  { %2310 = vmatpush1.bf16.msra.mxu1 %v3570_v6 }
  0xba   :  { %2311 = vmatprep.subr.bf16.mxu1 %v3578_v7 }
  0xbd   :  { %2312 = vmatpush1.bf16.msra.mxu1 %v3576_v8 }
  0xbe   :  { %2313 = vmatprep.subr.bf16.mxu1 %v3584_v10  ;;  %v3639_v10 = vld [vmem:[#allocation8 + $0x400] ss:$8 sps:$4 sm:$0xff]  }
  0xc1   :  { %2314 = vmatpush1.bf16.msra.mxu1 %v3582_v12  ;;  %v3647_v12 = vld [vmem:[#allocation8 + $0x414] ss:$8 sps:$4 sm:$0xff]  }
  0xc2   :  { %2315 = vmatprep.subr.bf16.mxu1 %v3590_v14  ;;  %v3645_v14 = vld [vmem:[#allocation8 + $0x410] ss:$8 sps:$4 sm:$0xff]  }
  0xc5   :  { %2316 = vmatpush1.bf16.msra.mxu1 %v3588_v16  ;;  %v3650_v16 = vld [vmem:[#allocation8 + $0x184] ss:$8 sps:$4 sm:$0xff]  }
  0xc6   :  { %2317 = vmatprep.subr.bf16.mxu1 %v3596_v18 }
  0xc9   :  { %2318 = vmatpush1.bf16.msra.mxu1 %v3594_v20 }
  0xca   :  { %2330 = vmatprep.subr.bf16.mxu1 %v3602_v21 }
 0x137   :  { %v164_v31 = vpop.f32.mrb[0].mxu1  ;;  %v4336_v32 = vpop.f32.mrb[0].mxu0 }
 0x138   :  { %v166_v33 = vpop.f32.mrb[1].mxu1  ;;  %v4338_v34 = vpop.f32.mrb[1].mxu0 }
 0x139   :  { %v168_v35 = vpop.f32.mrb[2].mxu1  ;;  %v4340_v36 = vpop.f32.mrb[2].mxu0 }
 0x13a   :  { %v173_v37 = vpack.c.bf16 %v168_v35, %v164_v31  ;;  %v170_v38 = vpop.f32.mrb[3].mxu1  ;;  %v485_v39 = vpack.c.bf16 %v4340_v36, %v4336_v32  ;;  %v4344_v40 = vpop.f32.mrb[3].mxu0  ;;  %v3660_v31 = vld [vmem:[#allocation8 + $0x1a0] ss:$8 sps:$4 sm:$0xff]   ;;  %v3671_v35 = vld [vmem:[#allocation8 + $0x454] ss:$8 sps:$4 sm:$0xff]  }
 0x13b   :  { %v174_v41 = vpack.c.bf16 %v170_v38, %v166_v33  ;;  %v486_v43 = vpack.c.bf16 %v4344_v40, %v4338_v34  ;;  %v3663_v33 = vld [vmem:[#allocation8 + $0x440] ss:$8 sps:$4 sm:$0xff]   ;;  %v3668_v34 = vld [vmem:[#allocation8 + $0x1b4] ss:$8 sps:$4 sm:$0xff]   ;;  %v3669_v38 = vld [vmem:[#allocation8 + $0x450] ss:$8 sps:$4 sm:$0xff]  }
 0x13c   :  { %v3674_v40 = vld [vmem:[#allocation8 + $0x1c4] ss:$8 sps:$4 sm:$0xff]   ;;  %v3755_v32 = vld [vmem:[#allocation8 + $0x534] ss:$8 sps:$4 sm:$0xff]   ;;  %v3750_v36 = vld [vmem:[#allocation8 + $0x290] ss:$8 sps:$4 sm:$0xff]  }
 0x13d   :  { %2319 = vmatprep.mubr.bf16.mxu1 %v174_v41  ;;  %v3677_v41 = vld [vmem:[#allocation8 + $0x464] ss:$8 sps:$4 sm:$0xff]  }
 0x13e   :  { %2320 = vmatmul.mubr.bf16.vlgmr.msra.gmra.mrb[24].mxu1 %v173_v37  ;;  %v3666_v37 = vld [vmem:[#allocation8 + $0x1b0] ss:$8 sps:$4 sm:$0xff]  }
 0x13f   :  { %2331 = vmatpush1.bf16.msra.mxu1 %v3600_v42  ;;  %v4348_v45 = vpop.f32.mrb[4].mxu1 }
 0x140   :  { %v244_v47 = vpop.f32.mrb[5].mxu1  ;;  %2332 = vmatprep.subr.bf16.mxu1 %v3608_v44 }
 0x141   :  { %v4350_v49 = vpop.f32.mrb[6].mxu1  ;;  %v4378_v42 = vpop.f32.mrb[4].mxu0 }
 0x142   :  { %v251_v50 = vpack.c.bf16 %v4350_v49, %v4348_v45  ;;  %v248_v51 = vpop.f32.mrb[7].mxu1  ;;  %v3719_v45 = vld [vmem:[#allocation8 + $0x4d4] ss:$8 sps:$4 sm:$0xff]   ;;  %v3714_v49 = vld [vmem:[#allocation8 + $0x230] ss:$8 sps:$4 sm:$0xff]  }
 0x143   :  { %v252_v52 = vpack.c.bf16 %v248_v51, %v244_v47  ;;  %2333 = vmatpush1.bf16.msra.mxu1 %v3606_v46  ;;  %v3672_v46 = vld [vmem:[#allocation8 + $0x1c0] ss:$8 sps:$4 sm:$0xff]  }
 0x144   :  { %2334 = vmatprep.subr.bf16.mxu1 %v3614_v48  ;;  %v3675_v47 = vld [vmem:[#allocation8 + $0x460] ss:$8 sps:$4 sm:$0xff]  }
 0x145   :  { %2362 = vmatprep.mubr.bf16.mxu1 %v252_v52  ;;  %v3680_v52 = vld [vmem:[#allocation8 + $0x1d4] ss:$8 sps:$4 sm:$0xff]  }
 0x147   :  { %2335 = vmatpush1.bf16.msra.mxu1 %v3612_v53  ;;  %v4354_v55 = vpop.f32.mrb[8].mxu1  ;;  %v3683_v53 = vld [vmem:[#allocation8 + $0x474] ss:$8 sps:$4 sm:$0xff]  }
 0x148   :  { %v4356_v57 = vpop.f32.mrb[9].mxu1  ;;  %2336 = vmatprep.subr.bf16.mxu1 %v3620_v54 }
 0x149   :  { %v4358_v59 = vpop.f32.mrb[10].mxu1 }
 0x14a   :  { %v329_v60 = vpack.c.bf16 %v4358_v59, %v4354_v55  ;;  %v4362_v61 = vpop.f32.mrb[11].mxu1 }
 0x14b   :  { %v330_v62 = vpack.c.bf16 %v4362_v61, %v4356_v57  ;;  %2337 = vmatpush1.bf16.msra.mxu1 %v3618_v56  ;;  %v3678_v56 = vld [vmem:[#allocation8 + $0x1d0] ss:$8 sps:$4 sm:$0xff]   ;;  %v3722_v57 = vld [vmem:[#allocation8 + $0x244] ss:$8 sps:$4 sm:$0xff]  }
 0x14c   :  { %2338 = vmatprep.subr.bf16.mxu1 %v3626_v58  ;;  %v3681_v58 = vld [vmem:[#allocation8 + $0x470] ss:$8 sps:$4 sm:$0xff]   ;;  %v3725_v61 = vld [vmem:[#allocation8 + $0x4e4] ss:$8 sps:$4 sm:$0xff]  }
 0x14f   :  { %2339 = vmatpush1.bf16.msra.mxu1 %v3624_v63  ;;  %v398_v1 = vpop.f32.mrb[12].mxu1  ;;  %v3686_v63 = vld [vmem:[#allocation8 + $0x1e4] ss:$8 sps:$4 sm:$0xff]  }
 0x150   :  { %v400_v3 = vpop.f32.mrb[13].mxu1  ;;  %2340 = vmatprep.subr.bf16.mxu1 %v3632_v0  ;;  %v3689_v0 = vld [vmem:[#allocation8 + $0x484] ss:$8 sps:$4 sm:$0xff]  }
 0x151   :  { %v402_v5 = vpop.f32.mrb[14].mxu1 }
 0x152   :  { %v407_v6 = vpack.c.bf16 %v402_v5, %v398_v1  ;;  %v404_v7 = vpop.f32.mrb[15].mxu1  ;;  %v3684_v1 = vld [vmem:[#allocation8 + $0x1e0] ss:$8 sps:$4 sm:$0xff]   ;;  %v3690_v5 = vld [vmem:[#allocation8 + $0x1f0] ss:$8 sps:$4 sm:$0xff]  }
 0x153   :  { %v408_v8 = vpack.c.bf16 %v404_v7, %v400_v3  ;;  %2341 = vmatpush1.bf16.msra.mxu1 %v3630_v2  ;;  %v3687_v2 = vld [vmem:[#allocation8 + $0x480] ss:$8 sps:$4 sm:$0xff]   ;;  %v3692_v3 = vld [vmem:[#allocation8 + $0x1f4] ss:$8 sps:$4 sm:$0xff]   ;;  %v3698_v7 = vld [vmem:[#allocation8 + $0x204] ss:$8 sps:$4 sm:$0xff]  }
 0x154   :  { %2342 = vmatprep.subr.bf16.mxu1 %v3638_v4  ;;  %v3695_v4 = vld [vmem:[#allocation8 + $0x494] ss:$8 sps:$4 sm:$0xff]  }
 0x155   :  { %2448 = vmatprep.mubr.bf16.mxu0 %v408_v8  ;;  %v3701_v8 = vld [vmem:[#allocation8 + $0x4a4] ss:$8 sps:$4 sm:$0xff]  }
 0x156   :  { %2449 = vmatmul.mubr.bf16.vlgmr.msra.gmra.mrb[8].mxu0 %v407_v6  ;;  %v3693_v6 = vld [vmem:[#allocation8 + $0x490] ss:$8 sps:$4 sm:$0xff]  }
 0x157   :  { %2343 = vmatpush1.bf16.msra.mxu1 %v3636_v9  ;;  %2460 = vmatpush1.bf16.msra.mxu0 %v3639_v10  ;;  %v4366_v15 = vpop.f32.mrb[16].mxu1  ;;  %v3696_v9 = vld [vmem:[#allocation8 + $0x200] ss:$8 sps:$4 sm:$0xff]  }
 0x158   :  { %2344 = vmatprep.subr.bf16.mxu1 %v3644_v11  ;;  %2461 = vmatprep.subr.bf16.mxu0 %v3647_v12  ;;  %v4368_v18 = vpop.f32.mrb[17].mxu1  ;;  %v3699_v10 = vld [vmem:[#allocation8 + $0x4a0] ss:$8 sps:$4 sm:$0xff]   ;;  %v3704_v11 = vld [vmem:[#allocation8 + $0x214] ss:$8 sps:$4 sm:$0xff]  }
 0x159   :  { %2491 = vmatprep.mubr.bf16.mxu0 %v486_v43  ;;  %v4370_v19 = vpop.f32.mrb[18].mxu1  ;;  %v4380_v43 = vpop.f32.mrb[5].mxu0  ;;  %v3707_v12 = vld [vmem:[#allocation8 + $0x4b4] ss:$8 sps:$4 sm:$0xff]  }
 0x15a   :  { %v563_v20 = vpack.c.bf16 %v4370_v19, %v4366_v15  ;;  %v4374_v21 = vpop.f32.mrb[19].mxu1  ;;  %v4382_v44 = vpop.f32.mrb[6].mxu0  ;;  %v3827_v15 = vld [vmem:[#allocation8 + $0x654] ss:$8 sps:$4 sm:$0xff]   ;;  %v3825_v19 = vld [vmem:[#allocation8 + $0x650] ss:$8 sps:$4 sm:$0xff]  }
 0x15b   :  { %2345 = vmatpush1.bf16.msra.mxu1 %v3642_v13  ;;  %2462 = vmatpush1.bf16.msra.mxu0 %v3645_v14  ;;  %v564_v24 = vpack.c.bf16 %v4374_v21, %v4368_v18  ;;  %v641_v48 = vpack.c.bf16 %v4382_v44, %v4378_v42  ;;  %v4386_v51 = vpop.f32.mrb[7].mxu0  ;;  %v3702_v13 = vld [vmem:[#allocation8 + $0x210] ss:$8 sps:$4 sm:$0xff]   ;;  %v3759_v18 = vld [vmem:[#allocation8 + $0x540] ss:$8 sps:$4 sm:$0xff]  }
 0x15c   :  { %2346 = vmatprep.subr.bf16.mxu1 %v3650_v16  ;;  %2463 = vmatprep.subr.bf16.mxu0 %v3653_v17  ;;  %v642_v54 = vpack.c.bf16 %v4386_v51, %v4380_v43  ;;  %v3705_v14 = vld [vmem:[#allocation8 + $0x4b0] ss:$8 sps:$4 sm:$0xff]   ;;  %v3710_v16 = vld [vmem:[#allocation8 + $0x224] ss:$8 sps:$4 sm:$0xff]   ;;  %v3764_v21 = vld [vmem:[#allocation8 + $0x2b4] ss:$8 sps:$4 sm:$0xff]  }
 0x15d   :  { %v3713_v17 = vld [vmem:[#allocation8 + $0x4c4] ss:$8 sps:$4 sm:$0xff]   ;;  %v3828_v43 = vld [vmem:[#allocation8 + $0x660] ss:$8 sps:$4 sm:$0xff]   ;;  %v3833_v51 = vld [vmem:[#allocation8 + $0x674] ss:$8 sps:$4 sm:$0xff]  }
 0x15e   :  { %v3912_v42 = vld [vmem:[#allocation9 + $0x20] ss:$8 sps:$4 sm:$0xff]   ;;  %v3917_v44 = vld [vmem:[#allocation9 + $0x34] ss:$8 sps:$4 sm:$0xff]  }
 0x15f   :  { %2347 = vmatpush1.bf16.msra.mxu1 %v3648_v22  ;;  %2464 = vmatpush1.bf16.msra.mxu0 %v3651_v23  ;;  %v3708_v22 = vld [vmem:[#allocation8 + $0x220] ss:$8 sps:$4 sm:$0xff]  }
 0x160   :  { %2348 = vmatprep.subr.bf16.mxu1 %v3656_v25  ;;  %2465 = vmatprep.subr.bf16.mxu0 %v3659_v26  ;;  %v3711_v23 = vld [vmem:[#allocation8 + $0x4c0] ss:$8 sps:$4 sm:$0xff]   ;;  %v3716_v25 = vld [vmem:[#allocation8 + $0x234] ss:$8 sps:$4 sm:$0xff]  }
 0x161   :  { %v3723_v26 = vld [vmem:[#allocation8 + $0x4e0] ss:$8 sps:$4 sm:$0xff]  }
 0x163   :  { %2349 = vmatpush1.bf16.msra.mxu1 %v3654_v27  ;;  %2466 = vmatpush1.bf16.msra.mxu0 %v3657_v28  ;;  %v3728_v27 = vld [vmem:[#allocation8 + $0x254] ss:$8 sps:$4 sm:$0xff]  }
 0x164   :  { %2350 = vmatprep.subr.bf16.mxu1 %v3662_v29  ;;  %2467 = vmatprep.subr.bf16.mxu0 %v3665_v30  ;;  %v3731_v28 = vld [vmem:[#allocation8 + $0x4f4] ss:$8 sps:$4 sm:$0xff]   ;;  %v3726_v29 = vld [vmem:[#allocation8 + $0x250] ss:$8 sps:$4 sm:$0xff]  }
 0x165   :  { %v3729_v30 = vld [vmem:[#allocation8 + $0x4f0] ss:$8 sps:$4 sm:$0xff]  }
 0x167   :  { %2351 = vmatpush1.bf16.msra.mxu1 %v3660_v31  ;;  %2468 = vmatpush1.bf16.msra.mxu0 %v3663_v33  ;;  %v3734_v31 = vld [vmem:[#allocation8 + $0x264] ss:$8 sps:$4 sm:$0xff]  }
 0x168   :  { %2352 = vmatprep.subr.bf16.mxu1 %v3668_v34  ;;  %2469 = vmatprep.subr.bf16.mxu0 %v3671_v35  ;;  %v3737_v33 = vld [vmem:[#allocation8 + $0x504] ss:$8 sps:$4 sm:$0xff]   ;;  %v3732_v34 = vld [vmem:[#allocation8 + $0x260] ss:$8 sps:$4 sm:$0xff]  }
 0x169   :  { %v3735_v35 = vld [vmem:[#allocation8 + $0x500] ss:$8 sps:$4 sm:$0xff]  }
 0x16b   :  { %2353 = vmatpush1.bf16.msra.mxu1 %v3666_v37  ;;  %2470 = vmatpush1.bf16.msra.mxu0 %v3669_v38  ;;  %v3740_v37 = vld [vmem:[#allocation8 + $0x274] ss:$8 sps:$4 sm:$0xff]  }
 0x16c   :  { %2354 = vmatprep.subr.bf16.mxu1 %v3674_v40  ;;  %2471 = vmatprep.subr.bf16.mxu0 %v3677_v41  ;;  %v3743_v38 = vld [vmem:[#allocation8 + $0x514] ss:$8 sps:$4 sm:$0xff]   ;;  %v3738_v40 = vld [vmem:[#allocation8 + $0x270] ss:$8 sps:$4 sm:$0xff]  }
 0x16d   :  { %v3741_v41 = vld [vmem:[#allocation8 + $0x510] ss:$8 sps:$4 sm:$0xff]  }
 0x16f   :  { %2355 = vmatpush1.bf16.msra.mxu1 %v3672_v46  ;;  %2472 = vmatpush1.bf16.msra.mxu0 %v3675_v47  ;;  %v3746_v46 = vld [vmem:[#allocation8 + $0x284] ss:$8 sps:$4 sm:$0xff]  }
 0x170   :  { %2356 = vmatprep.subr.bf16.mxu1 %v3680_v52  ;;  %2473 = vmatprep.subr.bf16.mxu0 %v3683_v53  ;;  %v3749_v47 = vld [vmem:[#allocation8 + $0x524] ss:$8 sps:$4 sm:$0xff]   ;;  %v3744_v52 = vld [vmem:[#allocation8 + $0x280] ss:$8 sps:$4 sm:$0xff]  }
 0x171   :  { %v3747_v53 = vld [vmem:[#allocation8 + $0x520] ss:$8 sps:$4 sm:$0xff]  }
 0x173   :  { %2357 = vmatpush1.bf16.msra.mxu1 %v3678_v56  ;;  %2474 = vmatpush1.bf16.msra.mxu0 %v3681_v58  ;;  %v3752_v56 = vld [vmem:[#allocation8 + $0x294] ss:$8 sps:$4 sm:$0xff]   ;;  %v3758_v58 = vld [vmem:[#allocation8 + $0x2a4] ss:$8 sps:$4 sm:$0xff]  }
 0x174   :  { %2358 = vmatprep.subr.bf16.mxu1 %v3686_v63  ;;  %2475 = vmatprep.subr.bf16.mxu0 %v3689_v0  ;;  %v3761_v63 = vld [vmem:[#allocation8 + $0x544] ss:$8 sps:$4 sm:$0xff]   ;;  %v3756_v0 = vld [vmem:[#allocation8 + $0x2a0] ss:$8 sps:$4 sm:$0xff]  }
 0x177   :  { %2359 = vmatpush1.bf16.msra.mxu1 %v3684_v1  ;;  %2476 = vmatpush1.bf16.msra.mxu0 %v3687_v2  ;;  %v3762_v1 = vld [vmem:[#allocation8 + $0x2b0] ss:$8 sps:$4 sm:$0xff]  }
 0x178   :  { %2360 = vmatprep.subr.bf16.mxu1 %v3692_v3  ;;  %2477 = vmatprep.subr.bf16.mxu0 %v3695_v4  ;;  %v3765_v2 = vld [vmem:[#allocation8 + $0x550] ss:$8 sps:$4 sm:$0xff]   ;;  %v3770_v3 = vld [vmem:[#allocation8 + $0x2c4] ss:$8 sps:$4 sm:$0xff]  }
 0x179   :  { %v3773_v4 = vld [vmem:[#allocation8 + $0x564] ss:$8 sps:$4 sm:$0xff]  }
 0x17b   :  { %2361 = vmatpush1.bf16.msra.mxu1 %v3690_v5  ;;  %2478 = vmatpush1.bf16.msra.mxu0 %v3693_v6  ;;  %v3768_v5 = vld [vmem:[#allocation8 + $0x2c0] ss:$8 sps:$4 sm:$0xff]  }
 0x17c   :  { %2373 = vmatprep.subr.bf16.mxu1 %v3698_v7  ;;  %2479 = vmatprep.subr.bf16.mxu0 %v3701_v8  ;;  %v3771_v6 = vld [vmem:[#allocation8 + $0x560] ss:$8 sps:$4 sm:$0xff]   ;;  %v3776_v7 = vld [vmem:[#allocation8 + $0x2d4] ss:$8 sps:$4 sm:$0xff]  }
 0x17d   :  { %v3779_v8 = vld [vmem:[#allocation8 + $0x574] ss:$8 sps:$4 sm:$0xff]  }
 0x17e   :  { %2363 = vmatmul.mubr.bf16.vlgmr.msra.gmra.mrb[24].mxu1 %v251_v50  ;;  %v3717_v50 = vld [vmem:[#allocation8 + $0x4d0] ss:$8 sps:$4 sm:$0xff]  }
 0x17f   :  { %2374 = vmatpush1.bf16.msra.mxu1 %v3696_v9  ;;  %2405 = vmatprep.mubr.bf16.mxu1 %v330_v62  ;;  %v3720_v62 = vld [vmem:[#allocation8 + $0x240] ss:$8 sps:$4 sm:$0xff]   ;;  %v3774_v9 = vld [vmem:[#allocation8 + $0x2d0] ss:$8 sps:$4 sm:$0xff]  }
 0x180   :  { %2480 = vmatpush1.bf16.msra.mxu0 %v3699_v10  ;;  %2375 = vmatprep.subr.bf16.mxu1 %v3704_v11  ;;  %v3777_v10 = vld [vmem:[#allocation8 + $0x570] ss:$8 sps:$4 sm:$0xff]   ;;  %v3782_v11 = vld [vmem:[#allocation8 + $0x2e4] ss:$8 sps:$4 sm:$0xff]  }
 0x181   :  { %2481 = vmatprep.subr.bf16.mxu0 %v3707_v12  ;;  %v3785_v12 = vld [vmem:[#allocation8 + $0x584] ss:$8 sps:$4 sm:$0xff]  }
 0x183   :  { %2376 = vmatpush1.bf16.msra.mxu1 %v3702_v13  ;;  %v3780_v13 = vld [vmem:[#allocation8 + $0x2e0] ss:$8 sps:$4 sm:$0xff]  }
 0x184   :  { %2482 = vmatpush1.bf16.msra.mxu0 %v3705_v14  ;;  %2377 = vmatprep.subr.bf16.mxu1 %v3710_v16  ;;  %v3783_v14 = vld [vmem:[#allocation8 + $0x580] ss:$8 sps:$4 sm:$0xff]   ;;  %v3788_v16 = vld [vmem:[#allocation8 + $0x2f4] ss:$8 sps:$4 sm:$0xff]  }
 0x185   :  { %2483 = vmatprep.subr.bf16.mxu0 %v3713_v17  ;;  %v3791_v17 = vld [vmem:[#allocation8 + $0x594] ss:$8 sps:$4 sm:$0xff]  }
 0x187   :  { %2378 = vmatpush1.bf16.msra.mxu1 %v3708_v22  ;;  %v3786_v22 = vld [vmem:[#allocation8 + $0x2f0] ss:$8 sps:$4 sm:$0xff]  }
 0x188   :  { %2484 = vmatpush1.bf16.msra.mxu0 %v3711_v23  ;;  %2379 = vmatprep.subr.bf16.mxu1 %v3716_v25  ;;  %v3789_v23 = vld [vmem:[#allocation8 + $0x590] ss:$8 sps:$4 sm:$0xff]   ;;  %v3794_v25 = vld [vmem:[#allocation8 + $0x5a4] ss:$8 sps:$4 sm:$0xff]  }
 0x189   :  { %2485 = vmatprep.subr.bf16.mxu0 %v3719_v45  ;;  %v3792_v45 = vld [vmem:[#allocation8 + $0x5a0] ss:$8 sps:$4 sm:$0xff]  }
 0x18b   :  { %2380 = vmatpush1.bf16.msra.mxu1 %v3714_v49  ;;  %v3797_v49 = vld [vmem:[#allocation8 + $0x5b4] ss:$8 sps:$4 sm:$0xff]  }
 0x18c   :  { %2486 = vmatpush1.bf16.msra.mxu0 %v3717_v50  ;;  %2381 = vmatprep.subr.bf16.mxu1 %v3722_v57  ;;  %v3795_v50 = vld [vmem:[#allocation8 + $0x5b0] ss:$8 sps:$4 sm:$0xff]   ;;  %v3800_v57 = vld [vmem:[#allocation8 + $0x5c4] ss:$8 sps:$4 sm:$0xff]  }
 0x18d   :  { %2487 = vmatprep.subr.bf16.mxu0 %v3725_v61  ;;  %v3798_v61 = vld [vmem:[#allocation8 + $0x5c0] ss:$8 sps:$4 sm:$0xff]  }
 0x18f   :  { %2382 = vmatpush1.bf16.msra.mxu1 %v3720_v62  ;;  %v3803_v62 = vld [vmem:[#allocation8 + $0x5d4] ss:$8 sps:$4 sm:$0xff]  }
 0x190   :  { %2488 = vmatpush1.bf16.msra.mxu0 %v3723_v26  ;;  %2383 = vmatprep.subr.bf16.mxu1 %v3728_v27  ;;  %v3801_v26 = vld [vmem:[#allocation8 + $0x5d0] ss:$8 sps:$4 sm:$0xff]   ;;  %v3806_v27 = vld [vmem:[#allocation8 + $0x5e4] ss:$8 sps:$4 sm:$0xff]  }
 0x191   :  { %2489 = vmatprep.subr.bf16.mxu0 %v3731_v28  ;;  %v3804_v28 = vld [vmem:[#allocation8 + $0x5e0] ss:$8 sps:$4 sm:$0xff]  }
 0x193   :  { %2384 = vmatpush1.bf16.msra.mxu1 %v3726_v29  ;;  %v4405_v29 = vpop.f32.mrb[20].mxu1 }
 0x194   :  { %2490 = vmatpush1.bf16.msra.mxu0 %v3729_v30  ;;  %2385 = vmatprep.subr.bf16.mxu1 %v3734_v31  ;;  %v3809_v30 = vld [vmem:[#allocation8 + $0x5f4] ss:$8 sps:$4 sm:$0xff]   ;;  %v4407_v55 = vpop.f32.mrb[21].mxu1  ;;  %v3807_v31 = vld [vmem:[#allocation8 + $0x5f0] ss:$8 sps:$4 sm:$0xff]  }
 0x195   :  { %2502 = vmatprep.subr.bf16.mxu0 %v3737_v33  ;;  %v4409_v59 = vpop.f32.mrb[22].mxu1 }
 0x196   :  { %v4413_v33 = vpop.f32.mrb[23].mxu1 }
 0x197   :  { %2492 = vmatmul.mubr.bf16.vlgmr.msra.gmra.mrb[8].mxu0 %v485_v39  ;;  %2386 = vmatpush1.bf16.msra.mxu1 %v3732_v34  ;;  %v3753_v39 = vld [vmem:[#allocation8 + $0x530] ss:$8 sps:$4 sm:$0xff]   ;;  %v3812_v34 = vld [vmem:[#allocation8 + $0x604] ss:$8 sps:$4 sm:$0xff]  }
 0x198   :  { %2503 = vmatpush1.bf16.msra.mxu0 %v3735_v35  ;;  %2387 = vmatprep.subr.bf16.mxu1 %v3740_v37  ;;  %v720_v35 = vpack.c.bf16 %v4413_v33, %v4407_v55  ;;  %v3810_v37 = vld [vmem:[#allocation8 + $0x600] ss:$8 sps:$4 sm:$0xff]   ;;  %v3926_v55 = vld [vmem:[#allocation9 + $0x64] ss:$8 sps:$4 sm:$0xff]   ;;  %v3881_v33 = vld [vmem:[#allocation8 + $0x774] ss:$8 sps:$4 sm:$0xff]  }
 0x199   :  { %2504 = vmatprep.subr.bf16.mxu0 %v3743_v38  ;;  %2534 = vmatprep.mubr.bf16.mxu0 %v564_v24  ;;  %v3767_v24 = vld [vmem:[#allocation8 + $0x554] ss:$8 sps:$4 sm:$0xff]  }
 0x19a   :  { %v3815_v38 = vld [vmem:[#allocation8 + $0x614] ss:$8 sps:$4 sm:$0xff]  }
 0x19b   :  { %2388 = vmatpush1.bf16.msra.mxu1 %v3738_v40  ;;  %v3813_v40 = vld [vmem:[#allocation8 + $0x610] ss:$8 sps:$4 sm:$0xff]  }
 0x19c   :  { %2505 = vmatpush1.bf16.msra.mxu0 %v3741_v41  ;;  %2389 = vmatprep.subr.bf16.mxu1 %v3746_v46  ;;  %v3818_v41 = vld [vmem:[#allocation8 + $0x624] ss:$8 sps:$4 sm:$0xff]   ;;  %v3816_v46 = vld [vmem:[#allocation8 + $0x620] ss:$8 sps:$4 sm:$0xff]  }
 0x19d   :  { %2506 = vmatprep.subr.bf16.mxu0 %v3749_v47  ;;  %v3821_v47 = vld [vmem:[#allocation8 + $0x634] ss:$8 sps:$4 sm:$0xff]  }
 0x19f   :  { %2390 = vmatpush1.bf16.msra.mxu1 %v3744_v52  ;;  %v3819_v52 = vld [vmem:[#allocation8 + $0x630] ss:$8 sps:$4 sm:$0xff]  }
 0x1a0   :  { %2507 = vmatpush1.bf16.msra.mxu0 %v3747_v53  ;;  %2391 = vmatprep.subr.bf16.mxu1 %v3752_v56  ;;  %v3824_v53 = vld [vmem:[#allocation8 + $0x644] ss:$8 sps:$4 sm:$0xff]   ;;  %v3822_v56 = vld [vmem:[#allocation8 + $0x640] ss:$8 sps:$4 sm:$0xff]  }
 0x1a1   :  { %2508 = vmatprep.subr.bf16.mxu0 %v3755_v32  ;;  %v3836_v32 = vld [vmem:[#allocation8 + $0x684] ss:$8 sps:$4 sm:$0xff]  }
 0x1a3   :  { %2392 = vmatpush1.bf16.msra.mxu1 %v3750_v36  ;;  %v3834_v36 = vld [vmem:[#allocation8 + $0x680] ss:$8 sps:$4 sm:$0xff]  }
 0x1a4   :  { %2509 = vmatpush1.bf16.msra.mxu0 %v3753_v39  ;;  %2393 = vmatprep.subr.bf16.mxu1 %v3758_v58  ;;  %v3839_v39 = vld [vmem:[#allocation8 + $0x694] ss:$8 sps:$4 sm:$0xff]   ;;  %v3837_v58 = vld [vmem:[#allocation8 + $0x690] ss:$8 sps:$4 sm:$0xff]  }
 0x1a5   :  { %2510 = vmatprep.subr.bf16.mxu0 %v3761_v63  ;;  %v3842_v63 = vld [vmem:[#allocation8 + $0x6a4] ss:$8 sps:$4 sm:$0xff]  }
 0x1a7   :  { %2394 = vmatpush1.bf16.msra.mxu1 %v3756_v0  ;;  %v3840_v0 = vld [vmem:[#allocation8 + $0x6a0] ss:$8 sps:$4 sm:$0xff]  }
 0x1a8   :  { %2511 = vmatpush1.bf16.msra.mxu0 %v3759_v18  ;;  %2395 = vmatprep.subr.bf16.mxu1 %v3764_v21  ;;  %v3845_v18 = vld [vmem:[#allocation8 + $0x6b4] ss:$8 sps:$4 sm:$0xff]   ;;  %v3843_v21 = vld [vmem:[#allocation8 + $0x6b0] ss:$8 sps:$4 sm:$0xff]  }
 0x1a9   :  { %2512 = vmatprep.subr.bf16.mxu0 %v3767_v24  ;;  %v3848_v24 = vld [vmem:[#allocation8 + $0x6c4] ss:$8 sps:$4 sm:$0xff]  }
 0x1ab   :  { %2396 = vmatpush1.bf16.msra.mxu1 %v3762_v1  ;;  %v3846_v1 = vld [vmem:[#allocation8 + $0x6c0] ss:$8 sps:$4 sm:$0xff]  }
 0x1ac   :  { %2513 = vmatpush1.bf16.msra.mxu0 %v3765_v2  ;;  %2397 = vmatprep.subr.bf16.mxu1 %v3770_v3  ;;  %v3851_v2 = vld [vmem:[#allocation8 + $0x6d4] ss:$8 sps:$4 sm:$0xff]   ;;  %v3849_v3 = vld [vmem:[#allocation8 + $0x6d0] ss:$8 sps:$4 sm:$0xff]  }
 0x1ad   :  { %2514 = vmatprep.subr.bf16.mxu0 %v3773_v4  ;;  %v3854_v4 = vld [vmem:[#allocation8 + $0x6e4] ss:$8 sps:$4 sm:$0xff]  }
 0x1af   :  { %2398 = vmatpush1.bf16.msra.mxu1 %v3768_v5  ;;  %v3852_v5 = vld [vmem:[#allocation8 + $0x6e0] ss:$8 sps:$4 sm:$0xff]  }
 0x1b0   :  { %2515 = vmatpush1.bf16.msra.mxu0 %v3771_v6  ;;  %2399 = vmatprep.subr.bf16.mxu1 %v3776_v7  ;;  %v3857_v6 = vld [vmem:[#allocation8 + $0x6f4] ss:$8 sps:$4 sm:$0xff]   ;;  %v3855_v7 = vld [vmem:[#allocation8 + $0x6f0] ss:$8 sps:$4 sm:$0xff]  }
 0x1b1   :  { %2516 = vmatprep.subr.bf16.mxu0 %v3779_v8  ;;  %v3860_v8 = vld [vmem:[#allocation8 + $0x704] ss:$8 sps:$4 sm:$0xff]  }
 0x1b3   :  { %2400 = vmatpush1.bf16.msra.mxu1 %v3774_v9  ;;  %v3858_v9 = vld [vmem:[#allocation8 + $0x700] ss:$8 sps:$4 sm:$0xff]  }
 0x1b4   :  { %2517 = vmatpush1.bf16.msra.mxu0 %v3777_v10  ;;  %2401 = vmatprep.subr.bf16.mxu1 %v3782_v11  ;;  %v3863_v10 = vld [vmem:[#allocation8 + $0x714] ss:$8 sps:$4 sm:$0xff]   ;;  %v3906_v11 = vld [vmem:[#allocation9] ss:$8 sps:$4 sm:$0xff]  }
 0x1b5   :  { %2518 = vmatprep.subr.bf16.mxu0 %v3785_v12  ;;  %v3908_v12 = vld [vmem:[#allocation9 + $0x4] ss:$8 sps:$4 sm:$0xff]  }
 0x1b7   :  { %2402 = vmatpush1.bf16.msra.mxu1 %v3780_v13  ;;  %v3911_v13 = vld [vmem:[#allocation9 + $0x14] ss:$8 sps:$4 sm:$0xff]  }
 0x1b8   :  { %2519 = vmatpush1.bf16.msra.mxu0 %v3783_v14  ;;  %2403 = vmatprep.subr.bf16.mxu1 %v3788_v16  ;;  %v3861_v14 = vld [vmem:[#allocation8 + $0x710] ss:$8 sps:$4 sm:$0xff]   ;;  %v3866_v16 = vld [vmem:[#allocation8 + $0x724] ss:$8 sps:$4 sm:$0xff]  }
 0x1b9   :  { %2520 = vmatprep.subr.bf16.mxu0 %v3791_v17  ;;  %v3909_v17 = vld [vmem:[#allocation9 + $0x10] ss:$8 sps:$4 sm:$0xff]  }
 0x1bb   :  { %2404 = vmatpush1.bf16.msra.mxu1 %v3786_v22  ;;  %v3914_v22 = vld [vmem:[#allocation9 + $0x24] ss:$8 sps:$4 sm:$0xff]  }
 0x1bc   :  { %2521 = vmatpush1.bf16.msra.mxu0 %v3789_v23  ;;  %2841 = vmatprep.subr.bf16.mxu1 %v3908_v12  ;;  %v3864_v23 = vld [vmem:[#allocation8 + $0x720] ss:$8 sps:$4 sm:$0xff]  }
 0x1bd   :  { %2522 = vmatprep.subr.bf16.mxu0 %v3794_v25  ;;  %v3869_v25 = vld [vmem:[#allocation8 + $0x734] ss:$8 sps:$4 sm:$0xff]   ;;  %v3948_v12 = vld [vmem:[#allocation9 + $0xe0] ss:$8 sps:$4 sm:$0xff]  }
 0x1be   :  { %2406 = vmatmul.mubr.bf16.vlgmr.msra.gmra.mrb[24].mxu1 %v329_v60  ;;  %v719_v60 = vpack.c.bf16 %v4409_v59, %v4405_v29  ;;  %v3953_v29 = vld [vmem:[#allocation9 + $0xf4] ss:$8 sps:$4 sm:$0xff]   ;;  %v3951_v59 = vld [vmem:[#allocation9 + $0xf0] ss:$8 sps:$4 sm:$0xff]  }
 0x1bf   :  { %2842 = vmatpush1.bf16.msra.mxu1 %v3906_v11  ;;  %v3950_v11 = vld [vmem:[#allocation9 + $0xe4] ss:$8 sps:$4 sm:$0xff]  }
 0x1c0   :  { %2523 = vmatpush1.bf16.msra.mxu0 %v3792_v45  ;;  %2843 = vmatprep.subr.bf16.mxu1 %v3911_v13  ;;  %v3872_v45 = vld [vmem:[#allocation8 + $0x744] ss:$8 sps:$4 sm:$0xff]   ;;  %v997_v13 = vlaneseq }
 0x1c1   :  { %2524 = vmatprep.subr.bf16.mxu0 %v3797_v49  ;;  %v3915_v49 = vld [vmem:[#allocation9 + $0x30] ss:$8 sps:$4 sm:$0xff]  }
 0x1c3   :  { %2844 = vmatpush1.bf16.msra.mxu1 %v3909_v17  ;;  %v995_v17 = vld [vmem:[%s4465_s3] sm:$0x3] }
 0x1c4   :  { %2525 = vmatpush1.bf16.msra.mxu0 %v3795_v50  ;;  %2845 = vmatprep.subr.bf16.mxu1 %v3914_v22  ;;  %v3920_v50 = vld [vmem:[#allocation9 + $0x44] ss:$8 sps:$4 sm:$0xff]  }
 0x1c5   :  { %2526 = vmatprep.subr.bf16.mxu0 %v3800_v57  ;;  %v3870_v57 = vld [vmem:[#allocation8 + $0x740] ss:$8 sps:$4 sm:$0xff]  }
 0x1c7   :  { %2846 = vmatpush1.bf16.msra.mxu1 %v3912_v42 }
 0x1c8   :  { %2527 = vmatpush1.bf16.msra.mxu0 %v3798_v61  ;;  %2847 = vmatprep.subr.bf16.mxu1 %v3917_v44  ;;  %v3875_v61 = vld [vmem:[#allocation8 + $0x754] ss:$8 sps:$4 sm:$0xff]  }
 0x1c9   :  { %2528 = vmatprep.subr.bf16.mxu0 %v3803_v62  ;;  %v3918_v62 = vld [vmem:[#allocation9 + $0x40] ss:$8 sps:$4 sm:$0xff]  }
 0x1cb   :  { %2848 = vmatpush1.bf16.msra.mxu1 %v3915_v49 }
 0x1cc   :  { %2529 = vmatpush1.bf16.msra.mxu0 %v3801_v26  ;;  %2849 = vmatprep.subr.bf16.mxu1 %v3920_v50  ;;  %v3923_v26 = vld [vmem:[#allocation9 + $0x54] ss:$8 sps:$4 sm:$0xff]  }
 0x1cd   :  { %2530 = vmatprep.subr.bf16.mxu0 %v3806_v27  ;;  %v3873_v27 = vld [vmem:[#allocation8 + $0x750] ss:$8 sps:$4 sm:$0xff]  }
 0x1cf   :  { %2850 = vmatpush1.bf16.msra.mxu1 %v3918_v62 }
 0x1d0   :  { %2531 = vmatpush1.bf16.msra.mxu0 %v3804_v28  ;;  %v3878_v28 = vld [vmem:[#allocation8 + $0x764] ss:$8 sps:$4 sm:$0xff]   ;;  %2851 = vmatprep.subr.bf16.mxu1 %v3923_v26 }
 0x1d1   :  { %2532 = vmatprep.subr.bf16.mxu0 %v3809_v30  ;;  %v3921_v30 = vld [vmem:[#allocation9 + $0x50] ss:$8 sps:$4 sm:$0xff]  }
 0x1d3   :  { %2852 = vmatpush1.bf16.msra.mxu1 %v3921_v30 }
 0x1d4   :  { %2533 = vmatpush1.bf16.msra.mxu0 %v3807_v31  ;;  %v3876_v31 = vld [vmem:[#allocation8 + $0x760] ss:$8 sps:$4 sm:$0xff]   ;;  %2853 = vmatprep.subr.bf16.mxu1 %v3926_v55 }
 0x1d5   :  { %2545 = vmatprep.subr.bf16.mxu0 %v3812_v34  ;;  %v3924_v34 = vld [vmem:[#allocation9 + $0x60] ss:$8 sps:$4 sm:$0xff]  }
 0x1d7   :  { %2535 = vmatmul.mubr.bf16.vlgmr.msra.gmra.mrb[8].mxu0 %v563_v20  ;;  %v3830_v20 = vld [vmem:[#allocation8 + $0x664] ss:$8 sps:$4 sm:$0xff]   ;;  %2854 = vmatpush1.bf16.msra.mxu1 %v3924_v34 }
 0x1d8   :  { %2546 = vmatpush1.bf16.msra.mxu0 %v3810_v37  ;;  %2577 = vmatprep.mubr.bf16.mxu0 %v642_v54  ;;  %v3831_v54 = vld [vmem:[#allocation8 + $0x670] ss:$8 sps:$4 sm:$0xff]  }
 0x1d9   :  { %2547 = vmatprep.subr.bf16.mxu0 %v3815_v38  ;;  %v3879_v37 = vld [vmem:[#allocation8 + $0x770] ss:$8 sps:$4 sm:$0xff]   ;;  %v3884_v38 = vld [vmem:[#allocation8 + $0x784] ss:$8 sps:$4 sm:$0xff]  }
 0x1dc   :  { %2548 = vmatpush1.bf16.msra.mxu0 %v3813_v40  ;;  %v3927_v40 = vld [vmem:[#allocation9 + $0x70] ss:$8 sps:$4 sm:$0xff]  }
 0x1dd   :  { %2549 = vmatprep.subr.bf16.mxu0 %v3818_v41  ;;  %v3932_v41 = vld [vmem:[#allocation9 + $0x84] ss:$8 sps:$4 sm:$0xff]  }
 0x1e0   :  { %2550 = vmatpush1.bf16.msra.mxu0 %v3816_v46  ;;  %v3882_v46 = vld [vmem:[#allocation8 + $0x780] ss:$8 sps:$4 sm:$0xff]  }
 0x1e1   :  { %2551 = vmatprep.subr.bf16.mxu0 %v3821_v47  ;;  %v3887_v47 = vld [vmem:[#allocation8 + $0x794] ss:$8 sps:$4 sm:$0xff]  }
 0x1e4   :  { %2552 = vmatpush1.bf16.msra.mxu0 %v3819_v52  ;;  %v3930_v52 = vld [vmem:[#allocation9 + $0x80] ss:$8 sps:$4 sm:$0xff]  }
 0x1e5   :  { %2553 = vmatprep.subr.bf16.mxu0 %v3824_v53  ;;  %v3935_v53 = vld [vmem:[#allocation9 + $0x94] ss:$8 sps:$4 sm:$0xff]  }
 0x1e8   :  { %2554 = vmatpush1.bf16.msra.mxu0 %v3822_v56  ;;  %v3885_v56 = vld [vmem:[#allocation8 + $0x790] ss:$8 sps:$4 sm:$0xff]  }
 0x1e9   :  { %2555 = vmatprep.subr.bf16.mxu0 %v3827_v15  ;;  %v3890_v15 = vld [vmem:[#allocation8 + $0x7a4] ss:$8 sps:$4 sm:$0xff]  }
 0x1ec   :  { %2556 = vmatpush1.bf16.msra.mxu0 %v3825_v19  ;;  %v3933_v19 = vld [vmem:[#allocation9 + $0x90] ss:$8 sps:$4 sm:$0xff]  }
 0x1ed   :  { %2557 = vmatprep.subr.bf16.mxu0 %v3830_v20  ;;  %v3938_v20 = vld [vmem:[#allocation9 + $0xa4] ss:$8 sps:$4 sm:$0xff]  }
 0x1f0   :  { %2558 = vmatpush1.bf16.msra.mxu0 %v3828_v43  ;;  %v3888_v43 = vld [vmem:[#allocation8 + $0x7a0] ss:$8 sps:$4 sm:$0xff]  }
 0x1f1   :  { %2559 = vmatprep.subr.bf16.mxu0 %v3833_v51  ;;  %v3893_v51 = vld [vmem:[#allocation8 + $0x7b4] ss:$8 sps:$4 sm:$0xff]  }
 0x1f4   :  { %2560 = vmatpush1.bf16.msra.mxu0 %v3831_v54  ;;  %v3936_v54 = vld [vmem:[#allocation9 + $0xa0] ss:$8 sps:$4 sm:$0xff]  }
 0x1f5   :  { %2561 = vmatprep.subr.bf16.mxu0 %v3836_v32  ;;  %v3891_v32 = vld [vmem:[#allocation8 + $0x7b0] ss:$8 sps:$4 sm:$0xff]  }
 0x1f8   :  { %2562 = vmatpush1.bf16.msra.mxu0 %v3834_v36  ;;  %v3896_v36 = vld [vmem:[#allocation8 + $0x7c4] ss:$8 sps:$4 sm:$0xff]  }
 0x1f9   :  { %2563 = vmatprep.subr.bf16.mxu0 %v3839_v39  ;;  %v3894_v39 = vld [vmem:[#allocation8 + $0x7c0] ss:$8 sps:$4 sm:$0xff]  }
 0x1fc   :  { %2564 = vmatpush1.bf16.msra.mxu0 %v3837_v58  ;;  %v3899_v58 = vld [vmem:[#allocation8 + $0x7d4] ss:$8 sps:$4 sm:$0xff]  }
 0x1fd   :  { %2565 = vmatprep.subr.bf16.mxu0 %v3842_v63  ;;  %v3897_v63 = vld [vmem:[#allocation8 + $0x7d0] ss:$8 sps:$4 sm:$0xff]  }
 0x200   :  { %2566 = vmatpush1.bf16.msra.mxu0 %v3840_v0  ;;  %v3902_v0 = vld [vmem:[#allocation8 + $0x7e4] ss:$8 sps:$4 sm:$0xff]  }
 0x201   :  { %2567 = vmatprep.subr.bf16.mxu0 %v3845_v18  ;;  %v3900_v18 = vld [vmem:[#allocation8 + $0x7e0] ss:$8 sps:$4 sm:$0xff]  }
 0x204   :  { %2568 = vmatpush1.bf16.msra.mxu0 %v3843_v21  ;;  %v3905_v21 = vld [vmem:[#allocation8 + $0x7f4] ss:$8 sps:$4 sm:$0xff]  }
 0x205   :  { %2569 = vmatprep.subr.bf16.mxu0 %v3848_v24  ;;  %v3903_v24 = vld [vmem:[#allocation8 + $0x7f0] ss:$8 sps:$4 sm:$0xff]  }
 0x208   :  { %2570 = vmatpush1.bf16.msra.mxu0 %v3846_v1 }
 0x209   :  { %2571 = vmatprep.subr.bf16.mxu0 %v3851_v2 }
 0x20c   :  { %2572 = vmatpush1.bf16.msra.mxu0 %v3849_v3 }
 0x20d   :  { %2573 = vmatprep.subr.bf16.mxu0 %v3854_v4 }
 0x210   :  { %2574 = vmatpush1.bf16.msra.mxu0 %v3852_v5  ;;  %v3941_v5 = vld [vmem:[#allocation9 + $0xb4] ss:$8 sps:$4 sm:$0xff]  }
 0x211   :  { %2575 = vmatprep.subr.bf16.mxu0 %v3857_v6  ;;  %v3939_v6 = vld [vmem:[#allocation9 + $0xb0] ss:$8 sps:$4 sm:$0xff]  }
 0x214   :  { %2576 = vmatpush1.bf16.msra.mxu0 %v3855_v7  ;;  %v3944_v7 = vld [vmem:[#allocation9 + $0xc4] ss:$8 sps:$4 sm:$0xff]  }
 0x215   :  { %2588 = vmatprep.subr.bf16.mxu0 %v3860_v8  ;;  %v3942_v8 = vld [vmem:[#allocation9 + $0xc0] ss:$8 sps:$4 sm:$0xff]  }
 0x217   :  { %2578 = vmatmul.mubr.bf16.vlgmr.msra.gmra.mrb[8].mxu0 %v641_v48  ;;  %v3867_v48 = vld [vmem:[#allocation8 + $0x730] ss:$8 sps:$4 sm:$0xff]  }
 0x218   :  { %2589 = vmatpush1.bf16.msra.mxu0 %v3858_v9  ;;  %2620 = vmatprep.mubr.bf16.mxu0 %v720_v35  ;;  %v3929_v35 = vld [vmem:[#allocation9 + $0x74] ss:$8 sps:$4 sm:$0xff]   ;;  %v3945_v9 = vld [vmem:[#allocation9 + $0xd0] ss:$8 sps:$4 sm:$0xff]  }
 0x219   :  { %2590 = vmatprep.subr.bf16.mxu0 %v3863_v10  ;;  %2855 = vmatprep.subr.bf16.mxu1 %v3929_v35  ;;  %v3947_v10 = vld [vmem:[#allocation9 + $0xd4] ss:$8 sps:$4 sm:$0xff]  }
 0x21a   :  { %2856 = vmatpush1.bf16.msra.mxu1 %v3927_v40  ;;  %v3957_v40 = vld [vmem:[#allocation11 + $0x8] sm:$0xff]  }
 0x21b   :  { %2857 = vmatprep.subr.bf16.mxu1 %v3932_v41  ;;  %v3958_v41 = vld [vmem:[#allocation11 + $0x50] sm:$0xff]  }
 0x21c   :  { %2591 = vmatpush1.bf16.msra.mxu0 %v3861_v14  ;;  %v4433_v14 = vshrl.u32 %v997_v13, 7 }
 0x21d   :  { %2592 = vmatprep.subr.bf16.mxu0 %v3866_v16 }
 0x21e   :  { %2858 = vmatpush1.bf16.msra.mxu1 %v3930_v52  ;;  %v999_v16 = vsub.s32 0, %v4433_v14  ;;  %v1003_v22 = vsub.s32 1, %v4433_v14  ;;  %v3961_v52 = vld [vmem:[#allocation11 + $0x18] sm:$0xff]  }
 0x21f   :  { %2859 = vmatprep.subr.bf16.mxu1 %v3935_v53  ;;  %v3962_v53 = vld [vmem:[#allocation11 + $0x60] sm:$0xff]  }
 0x220   :  { %2593 = vmatpush1.bf16.msra.mxu0 %v3864_v23  ;;  %v1000_v23 = vrot.slane %v995_v17, %v999_v16 }
 0x221   :  { %2594 = vmatprep.subr.bf16.mxu0 %v3869_v25  ;;  %v1004_v25 = vrot.slane %v995_v17, %v1003_v22 }
 0x222   :  { %2860 = vmatpush1.bf16.msra.mxu1 %v3933_v19  ;;  %v3965_v19 = vld [vmem:[#allocation11 + $0x28] sm:$0xff]  }
 0x223   :  { %2861 = vmatprep.subr.bf16.mxu1 %v3938_v20  ;;  %v3966_v20 = vld [vmem:[#allocation11 + $0x70] sm:$0xff]  }
 0x224   :  { %2595 = vmatpush1.bf16.msra.mxu0 %v3867_v48 }
 0x225   :  { %2596 = vmatprep.subr.bf16.mxu0 %v3872_v45 }
 0x226   :  { %2862 = vmatpush1.bf16.msra.mxu1 %v3936_v54  ;;  %v3969_v54 = vld [vmem:[#allocation11 + $0x38] sm:$0xff]  }
 0x227   :  { %2863 = vmatprep.subr.bf16.mxu1 %v3941_v5 }
 0x228   :  { %2597 = vmatpush1.bf16.msra.mxu0 %v3870_v57 }
 0x229   :  { %2598 = vmatprep.subr.bf16.mxu0 %v3875_v61 }
 0x22a   :  { %2864 = vmatpush1.bf16.msra.mxu1 %v3939_v6 }
 0x22b   :  { %2865 = vmatprep.subr.bf16.mxu1 %v3944_v7 }
 0x22c   :  { %2599 = vmatpush1.bf16.msra.mxu0 %v3873_v27 }
 0x22d   :  { %2600 = vmatprep.subr.bf16.mxu0 %v3878_v28 }
 0x22e   :  { %2866 = vmatpush1.bf16.msra.mxu1 %v3942_v8 }
 0x22f   :  { %2867 = vmatprep.subr.bf16.mxu1 %v3947_v10  ;;  %v3434_v10 = vld [vmem:[%s4469_s7] ss:$0 sm:$0xff]  ;;  %s4148_s7 = smov [#allocation12]  }
 0x230   :  { %2601 = vmatpush1.bf16.msra.mxu0 %v3876_v31  ;;  %s3092_s26 = sshll.u32 %s4148_s7, 4  ;;  %s3093_s26 = int_to_ptr.vmem [resolvable:$true] %s3092_s26 }
 0x231   :  { %2602 = vmatprep.subr.bf16.mxu0 %v3881_v33  ;;  %s4108_s27 = scalar_lea.vmem %s3093_s26, 256  ;;  %p4113_p13 = scmp.lt.s32.totalorder %s3093_s26, %s3093_s26 }
 0x232   :  { %2868 = vmatpush1.bf16.msra.mxu1 %v3945_v9  ;;  %p4109_p12 = scmp.ne.s32.totalorder %s3093_s26, %s4108_s27  ;;  %p4114_p0 = scmp.lt.s32.totalorder %s4108_s27, %s4108_s27 }
 0x233   :  { %2869 = vmatprep.subr.bf16.mxu1 %v3950_v11 }
 0x234   :  { %2603 = vmatpush1.bf16.msra.mxu0 %v3879_v37  ;;  %v3955_v37 = vld [vmem:[#allocation11] sm:$0xff]   ;;  %p4115_p1 = por %p4114_p0, %p4113_p13 }
 0x235   :  { %2604 = vmatprep.subr.bf16.mxu0 %v3884_v38  ;;  %v3956_v38 = vld [vmem:[#allocation11 + $0x48] sm:$0xff]  }
 0x236   :  { %2870 = vmatpush1.bf16.msra.mxu1 %v3948_v12  ;;  %p4116_p2 = pnand %p4115_p1, %p4109_p12 }
 0x237   :  { %2871 = vmatprep.subr.bf16.mxu1 %v3953_v29 }
 0x238   :  { %2605 = vmatpush1.bf16.msra.mxu0 %v3882_v46  ;;  %v3959_v46 = vld [vmem:[#allocation11 + $0x10] sm:$0xff]  }
 0x239   :  { %2606 = vmatprep.subr.bf16.mxu0 %v3887_v47  ;;  %v3960_v47 = vld [vmem:[#allocation11 + $0x58] sm:$0xff]  }
 0x23a   :  { %2872 = vmatpush1.bf16.msra.mxu1 %v3951_v59 }
 0x23c   :  { %2607 = vmatpush1.bf16.msra.mxu0 %v3885_v56  ;;  %v3963_v56 = vld [vmem:[#allocation11 + $0x20] sm:$0xff]  }
 0x23d   :  { %2608 = vmatprep.subr.bf16.mxu0 %v3890_v15  ;;  %v3964_v15 = vld [vmem:[#allocation11 + $0x68] sm:$0xff]  }
 0x240   :  { %2609 = vmatpush1.bf16.msra.mxu0 %v3888_v43  ;;  %v3967_v43 = vld [vmem:[#allocation11 + $0x30] sm:$0xff]  }
 0x241   :  { %2610 = vmatprep.subr.bf16.mxu0 %v3893_v51  ;;  %v3968_v51 = vld [vmem:[#allocation11 + $0x78] sm:$0xff]  }
 0x244   :  { %2611 = vmatpush1.bf16.msra.mxu0 %v3891_v32  ;;  %v2669_v32 = vld [vmem:[%s4467_s5] sm:$0x3] }
 0x245   :  { %2612 = vmatprep.subr.bf16.mxu0 %v3896_v36  ;;  %v2674_v36 = vrot.slane %v2669_v32, %v999_v16 }
 0x248   :  { %2613 = vmatpush1.bf16.msra.mxu0 %v3894_v39  ;;  %v2678_v39 = vrot.slane %v2669_v32, %v1003_v22 }
 0x249   :  { %2614 = vmatprep.subr.bf16.mxu0 %v3899_v58 }
 0x24c   :  { %2615 = vmatpush1.bf16.msra.mxu0 %v3897_v63 }
 0x24d   :  { %2616 = vmatprep.subr.bf16.mxu0 %v3902_v0 }
 0x250   :  { %2617 = vmatpush1.bf16.msra.mxu0 %v3900_v18 }
 0x251   :  { %2618 = vmatprep.subr.bf16.mxu0 %v3905_v21 }
 0x254   :  { %2619 = vmatpush1.bf16.msra.mxu0 %v3903_v24 }
 0x257   :  { %2621 = vmatmul.mubr.bf16.vlgmr.msra.gmra.mrb[8].mxu0 %v719_v60  ;;  %v3954_v60 = vld [vmem:[#allocation11 + $0x40] sm:$0xff]  }
 0x258   :  { %3451 = vmatprep.subr.bf16.mxu1 %v3954_v60 }
 0x291   :  { %v2407_v1 = vpop.f32.mrb[24].mxu1 }
 0x292   :  { %v2409_v2 = vpop.f32.mrb[25].mxu1  ;;  %v3473_v42 = vadd.f32 %v2407_v1, %v1000_v23 }
 0x293   :  { %v2411_v3 = vpop.f32.mrb[26].mxu1  ;;  %v3475_v44 = vadd.f32 %v2409_v2, %v1004_v25 }
 0x294   :  { %v2413_v4 = vpop.f32.mrb[27].mxu1  ;;  %v3477_v45 = vadd.f32 %v2411_v3, %v1000_v23 }
 0x295   :  { %v3479_v57 = vadd.f32 %v2413_v4, %v1004_v25 }
 0x32a   :  { %v2622_v48 = vpop.f32.mrb[8].mxu0 }
 0x32b   :  { %v3474_v49 = vadd.f32 %v3473_v42, %v2622_v48  ;;  %v2624_v50 = vpop.f32.mrb[9].mxu0  ;;  %v3073_v42 = vand.u32 127, %v997_v13 }
 0x32c   :  { %v3476_v61 = vadd.f32 %v3475_v44, %v2624_v50  ;;  %v2626_v62 = vpop.f32.mrb[10].mxu0 }
 0x32d   :  { %3970 = vtanh.f32 %v3474_v49  ;;  %v3478_v26 = vadd.f32 %v3477_v45, %v2626_v62  ;;  %v2628_v27 = vpop.f32.mrb[11].mxu0  ;;  %vm3074_vm1 = vcmp.lt.s32.totalorder %v3073_v42, 8 }
 0x32e   :  { %3972 = vtanh.f32 %v3476_v61  ;;  %v3480_v28 = vadd.f32 %v3479_v57, %v2628_v27 }
 0x32f   :  { %3974 = vtanh.f32 %v3478_v26 }
 0x330   :  { %3976 = vtanh.f32 %v3480_v28 }
 0x337   :  { %v3971_v30 = vpop.eup %3970 }
 0x338   :  { %v3973_v55 = vpop.eup %3972 }
 0x339   :  { %v3975_v31 = vpop.eup %3974 }
 0x33a   :  { %v3977_v33 = vpop.eup %3976  ;;  %v2635_v34 = vpack.c.bf16 %v3975_v31, %v3971_v30 }
 0x33b   :  { %v2636_v35 = vpack.c.bf16 %v3977_v33, %v3973_v55 }
 0x33d   :  { %2873 = vmatprep.mubr.bf16.mxu1 %v2636_v35 }
 0x33e   :  { %2874 = vmatmul.mubr.bf16.vlgmr.msra.gmra.mrb[28].mxu1 %v2635_v34 }
 0x33f   :  { %3452 = vmatpush3.bf16.msra.mxu1 %v3955_v37 }
 0x340   :  { %3453 = vmatprep.subr.bf16.mxu1 %v3956_v38 }
 0x343   :  { %3454 = vmatpush3.bf16.msra.mxu1 %v3957_v40 }
 0x344   :  { %3455 = vmatprep.subr.bf16.mxu1 %v3958_v41 }
 0x347   :  { %3456 = vmatpush3.bf16.msra.mxu1 %v3959_v46 }
 0x348   :  { %3457 = vmatprep.subr.bf16.mxu1 %v3960_v47 }
 0x34b   :  { %3458 = vmatpush3.bf16.msra.mxu1 %v3961_v52 }
 0x34c   :  { %3459 = vmatprep.subr.bf16.mxu1 %v3962_v53 }
 0x34f   :  { %3460 = vmatpush3.bf16.msra.mxu1 %v3963_v56 }
 0x350   :  { %3461 = vmatprep.subr.bf16.mxu1 %v3964_v15 }
 0x353   :  { %3462 = vmatpush3.bf16.msra.mxu1 %v3965_v19 }
 0x354   :  { %3463 = vmatprep.subr.bf16.mxu1 %v3966_v20 }
 0x357   :  { %3464 = vmatpush3.bf16.msra.mxu1 %v3967_v43 }
 0x358   :  { %3465 = vmatprep.subr.bf16.mxu1 %v3968_v51 }
 0x35b   :  { %3466 = vmatpush3.bf16.msra.mxu1 %v3969_v54 }
 0x411   :  { %v2875_v58 = vpop.f32.mrb[28].mxu1 }
 0x412   :  { %v2876_v63 = vadd.f32 %v2875_v58, %v2674_v36  ;;  %v2877_v0 = vpop.f32.mrb[29].mxu1 }
 0x413   :  { %v2878_v18 = vadd.f32 %v2877_v0, %v2678_v39  ;;  %v2879_v21 = vpop.f32.mrb[30].mxu1 }
 0x414   :  { %3978 = vtanh.f32 %v2876_v63  ;;  %v2880_v24 = vadd.f32 %v2879_v21, %v2674_v36  ;;  %v2881_v1 = vpop.f32.mrb[31].mxu1 }
 0x415   :  { %3980 = vtanh.f32 %v2878_v18  ;;  %v2882_v2 = vadd.f32 %v2881_v1, %v2678_v39 }
 0x416   :  { %3982 = vtanh.f32 %v2880_v24 }
 0x417   :  { %3984 = vtanh.f32 %v2882_v2 }
 0x41e   :  { %v3979_v3 = vpop.eup %3978 }
 0x41f   :  { %v3981_v4 = vpop.eup %3980 }
 0x420   :  { %v3983_v5 = vpop.eup %3982 }
 0x421   :  { %v3985_v6 = vpop.eup %3984  ;;  %v2888_v7 = vpack.c.bf16 %v3983_v5, %v3979_v3 }
 0x422   :  { %v2889_v8 = vpack.c.bf16 %v3985_v6, %v3981_v4 }
 0x424   :  { %3057 = vmatprep.mubr.bf16.mxu1 %v2889_v8 }
 0x425   :  { %3058 = vmatmul.mubr.bf16.vlgmr.msra.gmra.mrb[32].mxu1 %v2888_v7 }
 0x4f8   :  { %v3467_v9 = vpop.f32.mrb[32].mxu1 }
 0x4f9   :  { %v3468_v11 = vpop.f32.mrb[33].mxu1 }
 0x4fa   :  { %v3469_v12 = vadd.f32 %v3468_v11, %v3467_v9  ;;  %v3470_v29 = vpop.f32.mrb[34].mxu1 }
 0x4fb   :  { %v3471_v59 = vpop.f32.mrb[35].mxu1 }
 0x4fc   :  { %v3060_v60 = vadd.f32 %v3469_v12, %v3434_v10  ;;  %v3472_v14 = vadd.f32 %v3471_v59, %v3470_v29 }
 0x4fe   :  { %3986 = vtanh.f32 %v3060_v60  ;;  %v3063_v16 = vadd.f32 %v3472_v14, %v3434_v10 }
 0x500   :  { %3988 = vtanh.f32 %v3063_v16 }
 0x508   :  { %v3987_v17 = vpop.eup %3986 }
 0x509   :  { %v3068_v22 = vmul.f32 1.442695, %v3987_v17 }
 0x50a   :  { %v3989_v23 = vpop.eup %3988 }
 0x50b   :  { %3990 = vpow2.f32 %v3068_v22  ;;  %v3070_v25 = vmul.f32 1.442695, %v3989_v23 }
 0x50d   :  { %3992 = vpow2.f32 %v3070_v25 }
 0x515   :  { %v3991_v44 = vpop.eup %3990 }
 0x516   :  { %v3075_v48 = vsel %vm3074_vm1, %v3991_v44, 0.0 }
 0x517   :  { %v3993_v45 = vpop.eup %3992  ;;  %3077 = vadd.xlane.f32.xlu0 %v3075_v48 }
 0x518   :  { %v3076_v49 = vsel %vm3074_vm1, %v3993_v45, 0.0 }
 0x51b   :  { %3079 = vadd.xlane.f32.xlu0 %v3076_v49 }
 0x5a4   :  { %v3078_v50 = vpop.xlane.xlu0 %3077 }
 0x5a5   :  { %3994 = vrcp.f32 %v3078_v50 }
 0x5a8   :  { %v3080_v57 = vpop.xlane.xlu0 %3079 }
 0x5a9   :  { %3996 = vrcp.f32 %v3080_v57 }
 0x5af   :  { %v3995_v61 = vpop.eup %3994 }
 0x5b0   :  { %v3082_v62 = vmul.f32 %v3995_v61, %v3075_v48 }
 0x5b2   :  { %3085 = vst [vmem:[#allocation12] sm:$0xff] %v3082_v62 }
 0x5b3   :  { %v3997_v26 = vpop.eup %3996 }
 0x5b4   :  { %v3084_v27 = vmul.f32 %v3997_v26, %v3076_v49 }
 0x5b6   :  { %3086 = vst [vmem:[#allocation12 + $0x8] sm:$0xff] %v3084_v27 }
 0x5b7   :  { %4119 = shalt.err (!%p4116_p2)
}
 0x5b8   :  { %s4120_s28 = scalar_lea.hbm %s4470_s8, 256 }
 0x5b9   :  { %p4121_p3 = scmp.ne.s32.totalorder %s4470_s8, %s4120_s28  ;;  %p4124_p4 = scmp.lt.u32.totalorder %s4120_s28, %s4470_s8 }
 0x5bb   :  { %p4126_p5 = pnand %p4124_p4, %p4121_p3 }
 0x5bd   :  { %4129 = shalt.err (!%p4126_p5)
}
 0x5be   :  { %3098 = dma.vmem_to_hbm [thread:$0]  %s3093_s26, 256, %s4470_s8, [#allocation5], %s4140_s17, %s4140_s17, %s4141_s18  }
 0x5bf   :  { %4136 = dma.done.wait [#allocation5], 256  }
 0x5c0   :  { %4137 = vsyncadd [#allocation5], 4294967040 }
 0x5c1   :  { %3102 = vsyncpa [#allocation4], 1 }
 0x5c2   :  { %3103 = vsyncpa [#allocation7], 1 }
 0x5c3   :  { %3104 = vsyncpa [#allocation10], 1 }
 0x5c4   :  { %3105 = vsyncpa [#allocation5], 1 }

</bundles_post_ra>
